<compile_context>
chip_gen: v5e
topology: v5e:2x2
jax: 0.10.0
libtpu: 0.0.40
codegen_flags: <defaults>
</compile_context>

<pallas_src>
import functools
import numpy as np

import jax
import jax.numpy as jnp
from jax.experimental import pallas as pl
from jax.experimental.pallas import tpu as pltpu

LN_EPS = 1e-5        # PyTorch nn.LayerNorm default
MASK_NEG = -1e30     # finite "minus infinity" for masked softmax logits


# ----------------------------------------------------------------------------
# Sinusoid position table (numpy mirror of the PyTorch helper)
# ----------------------------------------------------------------------------
def get_sinusoid_encoding_table_np(n_position, d_hid, padding_idx=None):
    def cal_angle(position, hid_idx):
        return position / np.power(10000, 2 * (hid_idx // 2) / d_hid)

    def get_posi_angle_vec(position):
        return [cal_angle(position, hid_j) for hid_j in range(d_hid)]

    table = np.array([get_posi_angle_vec(p) for p in range(n_position)])
    table[:, 0::2] = np.sin(table[:, 0::2])
    table[:, 1::2] = np.cos(table[:, 1::2])
    if padding_idx is not None:
        table[padding_idx] = 0.0
    return table.astype(np.float32)


# ----------------------------------------------------------------------------
# Shared math helpers (bf16 MXU operands, f32 accumulation) used by both the
# kernel and the pure-JAX reference so the correctness check compares kernel
# structure, not MXU operand precision.
# ----------------------------------------------------------------------------
def mxu_dot(a, b):
    return jnp.dot(a.astype(jnp.bfloat16), b.astype(jnp.bfloat16),
                   preferred_element_type=jnp.float32)


def mxu_einsum(eq, a, b):
    return jnp.einsum(eq, a.astype(jnp.bfloat16), b.astype(jnp.bfloat16),
                      preferred_element_type=jnp.float32)


def _layer_norm(y, g, b):
    mu = jnp.mean(y, axis=-1, keepdims=True)
    var = jnp.mean(jnp.square(y - mu), axis=-1, keepdims=True)
    return (y - mu) * jax.lax.rsqrt(var + LN_EPS) * g + b


# ----------------------------------------------------------------------------
# Fused encoder kernel: grid step (b, l) processes `Bb` batch items through
# layer l; the activation is carried in a VMEM scratch across the layer axis.
# ----------------------------------------------------------------------------
def encoder_kernel(x_ref, pos_ref, mbias_ref, mkeep_ref,
                   wqkv_ref, bqkv_ref, wo_ref, bo_ref, ln1g_ref, ln1b_ref,
                   w1_ref, b1_ref, w2_ref, b2_ref, ln2g_ref, ln2b_ref,
                   o_ref, act_ref, *conv_scratch,
                   n_head, d_k, k1, k2):
    Bb, T, D = x_ref.shape
    M = Bb * T
    hd = n_head * d_k
    scale = 1.0 / float(np.sqrt(d_k))

    l = pl.program_id(1)
    n_l = pl.num_programs(1)

    # Unpack the optional conv pad scratches (only allocated when kernel > 1).
    si = 0
    xpad_ref = None
    hpad_ref = None
    if k1 > 1:
        xpad_ref = conv_scratch[si]
        si += 1
    if k2 > 1:
        hpad_ref = conv_scratch[si]
        si += 1

    # Layer 0: fold the positional encoding into the initial activation.
    @pl.when(l == 0)
    def _():
        act_ref[...] = x_ref[...] + pos_ref[...]

    # Masks: additive key-pad bias (0 / MASK_NEG) and query keep multiplier.
    mask_bias = mbias_ref[...]                                   # (Bb, 1, T)
    qkeep = jnp.broadcast_to(mkeep_ref[...], (Bb, T, D)).reshape(M, D)

    x = act_ref[...].reshape(M, D)                               # f32 (M, D)

    # ---------------- multi-head self-attention sub-block --------------------
    xb = x.astype(jnp.bfloat16)
    # fused QKV projection: ONE (M, D) @ (D, 3*H*d_k) MXU matmul
    qkv = mxu_dot(xb, wqkv_ref[...]) + bqkv_ref[...]             # (M, 3*H*d_k)
    q = qkv[:, :hd] * scale          # scale folded into q (M x d_k, not T x T)
    k = qkv[:, hd:2 * hd]
    v = qkv[:, 2 * hd:]

    ctx_heads = []
    for h in range(n_head):
        lo, hi = h * d_k, (h + 1) * d_k
        qh = q[:, lo:hi].reshape(Bb, T, d_k)
        kh = k[:, lo:hi].reshape(Bb, T, d_k)
        vh = v[:, lo:hi].reshape(Bb, T, d_k)
        s = mxu_einsum("bqd,bkd->bqk", qh, kh) + mask_bias       # (Bb, T, T)
        m = jnp.max(s, axis=-1, keepdims=True)
        p = jnp.exp(s - m)
        denom = jnp.sum(p, axis=-1, keepdims=True)
        p = p * pl.reciprocal(denom, approx=True)                # EUP, not VALU
        ctx_heads.append(mxu_einsum("bqk,bkd->bqd", p, vh).reshape(M, d_k))
    ctx = jnp.concatenate(ctx_heads, axis=-1)                    # (M, H*d_k)

    # single output projection with K = H*d_k
    attn = mxu_dot(ctx, wo_ref[...]) + bo_ref[...]
    y = _layer_norm(attn + x, ln1g_ref[...], ln1b_ref[...])
    x = y * qkeep                                                # masked_fill(0)

    # ---------------- position-wise conv feed-forward sub-block --------------
    def conv1d(xrow, w_ref, b, ksize, pad_scratch):
        """'same' Conv1d (odd ksize) as ksize accumulated shifted matmuls.
        xrow: (M, Din) f32; w_ref: (ksize, Din, Dout) bf16; b: (1, Dout) f32."""
        din = xrow.shape[-1]
        dout = w_ref.shape[-1]
        xrow_b = xrow.astype(jnp.bfloat16)
        if ksize == 1:
            return jnp.dot(xrow_b, w_ref[0],
                           preferred_element_type=jnp.float32) + b
        pad = (ksize - 1) // 2
        tail = ksize - 1 - pad
        # zero only the halo rows; interior is fully overwritten (bf16 scratch)
        if pad > 0:
            pad_scratch[:, pl.ds(0, pad), :] = jnp.zeros((Bb, pad, din),
                                                         jnp.bfloat16)
        if tail > 0:
            pad_scratch[:, pl.ds(pad + T, tail), :] = jnp.zeros(
                (Bb, tail, din), jnp.bfloat16)
        pad_scratch[:, pl.ds(pad, T), :] = xrow_b.reshape(Bb, T, din)
        acc = jnp.zeros((M, dout), jnp.float32) + b
        for t in range(ksize):
            shifted = pad_scratch[:, pl.ds(t, T), :].reshape(M, din)
            acc = acc + jnp.dot(shifted, w_ref[t],
                                preferred_element_type=jnp.float32)
        return acc

    hmid = jnp.maximum(conv1d(x, w1_ref, b1_ref[...], k1, xpad_ref), 0.0)
    out = conv1d(hmid, w2_ref, b2_ref[...], k2, hpad_ref)
    y = _layer_norm(out + x, ln2g_ref[...], ln2b_ref[...])
    x = y * qkeep                                                # masked_fill(0)

    act_ref[...] = x.reshape(Bb, T, D)

    @pl.when(l == n_l - 1)
    def _():
        o_ref[...] = act_ref[...]


# ----------------------------------------------------------------------------
# Host-side parameter preparation: fused QKV, layer stacking, bf16 cast for
# matmul operands (conv weights stay (k, Din, Dout) for the shifted-matmul FFN).
# ----------------------------------------------------------------------------
def prepare_encoder_params(params, n_head, d_k, k1, k2,
                           matmul_dtype=jnp.bfloat16):
    def stack(fn, dtype):
        return jnp.stack([fn(p) for p in params], axis=0).astype(dtype)

    return dict(
        wqkv=stack(lambda p: jnp.concatenate([p["wq"], p["wk"], p["wv"]],
                                             axis=-1), matmul_dtype),
        bqkv=stack(lambda p: jnp.concatenate([p["bq"], p["bk"], p["bv"]],
                                             axis=-1), jnp.float32),
        wo=stack(lambda p: p["wo"], matmul_dtype),
        bo=stack(lambda p: p["bo"], jnp.float32),
        ln1_g=stack(lambda p: p["ln1_g"], jnp.float32),
        ln1_b=stack(lambda p: p["ln1_b"], jnp.float32),
        w1=stack(lambda p: p["w1"], matmul_dtype),
        b1=stack(lambda p: p["b1"], jnp.float32),
        w2=stack(lambda p: p["w2"], matmul_dtype),
        b2=stack(lambda p: p["b2"], jnp.float32),
        ln2_g=stack(lambda p: p["ln2_g"], jnp.float32),
        ln2_b=stack(lambda p: p["ln2_b"], jnp.float32),
    )


def _pick_batch_block(B, T):
    # Fold enough batch items per grid step to give the MXU a reasonable
    # M = bblk*T (target >= 128 rows), but keep at least 2 steps on the
    # "parallel" batch axis when B allows it (both v7x TensorCores used).
    max_blk = B if B < 2 else max(1, B // 2)
    target = min(max_blk, max(1, -(-128 // T)))
    while B % target:
        target -= 1
    return target


# ----------------------------------------------------------------------------
# Encoder forward: a single fused pallas_call with per-layer weight streaming.
# ----------------------------------------------------------------------------
def encoder_forward(src_seq, mask, pos_table, stacked, *, n_head, d_k, k1, k2,
                    batch_block=None):
    B, T, D = src_seq.shape
    L = stacked["wqkv"].shape[0]
    d_inner = stacked["b1"].shape[-1]
    assert k1 % 2 == 1 and k2 % 2 == 1, "'same' conv padding needs odd kernels"
    bblk = batch_block or _pick_batch_block(B, T)
    assert B % bblk == 0

    maskf = mask.astype(jnp.float32)
    mask_bias = maskf[:, None, :] * MASK_NEG     # (B, 1, T) additive key bias
    mask_keep = (1.0 - maskf)[:, :, None]        # (B, T, 1) query keep
    pos = pos_table[:T, :].astype(jnp.float32)

    def wspec(arr):
        """Layer-stacked weight: squeeze the leading layer dim, index by l."""
        nd = arr.ndim
        return pl.BlockSpec((None,) + tuple(arr.shape[1:]),
                            lambda b, l, _nd=nd: (l,) + (0,) * (_nd - 1))

    kern = functools.partial(encoder_kernel, n_head=n_head, d_k=d_k,
                             k1=k1, k2=k2)

    scratch_shapes = [pltpu.VMEM((bblk, T, D), jnp.float32)]   # carried act
    if k1 > 1:
        scratch_shapes.append(pltpu.VMEM((bblk, T + k1 - 1, D), jnp.bfloat16))
    if k2 > 1:
        scratch_shapes.append(
            pltpu.VMEM((bblk, T + k2 - 1, d_inner), jnp.bfloat16))

    return pl.pallas_call(
        kern,
        out_shape=jax.ShapeDtypeStruct((B, T, D), jnp.float32),
        grid_spec=pltpu.PrefetchScalarGridSpec(
            num_scalar_prefetch=0,
            grid=(B // bblk, L),
            in_specs=[
                pl.BlockSpec((bblk, T, D), lambda b, l: (b, 0, 0)),  # src
                pl.BlockSpec((T, D), lambda b, l: (0, 0)),           # pos table
                pl.BlockSpec((bblk, 1, T), lambda b, l: (b, 0, 0)),  # key bias
                pl.BlockSpec((bblk, T, 1), lambda b, l: (b, 0, 0)),  # query keep
                wspec(stacked["wqkv"]), wspec(stacked["bqkv"]),
                wspec(stacked["wo"]), wspec(stacked["bo"]),
                wspec(stacked["ln1_g"]), wspec(stacked["ln1_b"]),
                wspec(stacked["w1"]), wspec(stacked["b1"]),
                wspec(stacked["w2"]), wspec(stacked["b2"]),
                wspec(stacked["ln2_g"]), wspec(stacked["ln2_b"]),
            ],
            out_specs=pl.BlockSpec((bblk, T, D), lambda b, l: (b, 0, 0)),
            scratch_shapes=scratch_shapes,
        ),
        compiler_params=pltpu.CompilerParams(
            dimension_semantics=("parallel", "arbitrary"),
            vmem_limit_bytes=48 * 1024 * 1024),
    )(src_seq, pos, mask_bias, mask_keep,
      stacked["wqkv"], stacked["bqkv"], stacked["wo"], stacked["bo"],
      stacked["ln1_g"], stacked["ln1_b"],
      stacked["w1"], stacked["b1"], stacked["w2"], stacked["b2"],
      stacked["ln2_g"], stacked["ln2_b"])


# ----------------------------------------------------------------------------
# Pure-JAX reference (mirrors PyTorch Encoder/FFTBlock math; uses the same
# bf16-operand / f32-accumulate matmul precision as the kernel's MXU path).
# ----------------------------------------------------------------------------
def encoder_ref(src_seq, mask, pos_table, params, n_head, d_k, k1, k2):
    B, T, D = src_seq.shape
    x = src_seq + pos_table[None, :T, :]
    kmask = mask[:, None, None, :]   # (B,1,1,T)
    qmask = mask[:, :, None]         # (B,T,1)
    scale = 1.0 / float(np.sqrt(d_k))
    for p in params:
        q = mxu_einsum("btd,dh->bth", x, p["wq"]) + p["bq"]
        k = mxu_einsum("btd,dh->bth", x, p["wk"]) + p["bk"]
        v = mxu_einsum("btd,dh->bth", x, p["wv"]) + p["bv"]

        def split(a):
            return a.reshape(B, T, n_head, d_k).transpose(0, 2, 1, 3)

        qh, kh, vh = split(q), split(k), split(v)
        s = mxu_einsum("bhqd,bhkd->bhqk", qh, kh) * scale
        s = jnp.where(kmask, MASK_NEG, s)
        m = jnp.max(s, -1, keepdims=True)
        pr = jnp.exp(s - m)
        pr = pr / jnp.sum(pr, -1, keepdims=True)
        o = mxu_einsum("bhqk,bhkd->bhqd", pr, vh)
        o = o.transpose(0, 2, 1, 3).reshape(B, T, n_head * d_k)
        o = mxu_einsum("bth,hd->btd", o, p["wo"]) + p["bo"]
        x = _layer_norm(o + x, p["ln1_g"], p["ln1_b"])
        x = jnp.where(qmask, 0.0, x)

        pad1, pad2 = (k1 - 1) // 2, (k2 - 1) // 2
        xp = jnp.pad(x, ((0, 0), (pad1, k1 - 1 - pad1), (0, 0)))
        h = sum(mxu_einsum("btd,dh->bth", xp[:, t:t + T, :], p["w1"][t])
                for t in range(k1)) + p["b1"][None]
        h = jnp.maximum(h, 0.0)
        hp = jnp.pad(h, ((0, 0), (pad2, k2 - 1 - pad2), (0, 0)))
        o2 = sum(mxu_einsum("bth,hd->btd", hp[:, t:t + T, :], p["w2"][t])
                 for t in range(k2)) + p["b2"][None]
        x = _layer_norm(o2 + x, p["ln2_g"], p["ln2_b"])
        x = jnp.where(qmask, 0.0, x)
    return x


# ----------------------------------------------------------------------------
if __name__ == "__main__":
    # small, deterministic config
    B, T = 2, 16
    D = 32                      # encoder_hidden
    n_layers = 2                # encoder_layer
    n_head = 2                  # encoder_head
    d_k = D // n_head
    d_inner = 64                # conv_filter_size
    k1, k2 = 9, 1               # conv_kernel_size
    max_seq_len = 16

    pos_table = jnp.asarray(get_sinusoid_encoding_table_np(max_seq_len + 1, D))

    key = jax.random.PRNGKey(0)
    keys = iter(jax.random.split(key, 1 + 16 * n_layers))

    def nrm(shape, scale=0.1):
        return scale * jax.random.normal(next(keys), shape, jnp.float32)

    # inputs: pre-embedded float sequence + boolean padding mask (True = PAD)
    src_seq = 0.5 * jax.random.normal(next(keys), (B, T, D), jnp.float32)
    mask_np = np.zeros((B, T), dtype=bool)
    mask_np[1, -3:] = True
    mask = jnp.asarray(mask_np)

    # deterministic FFTBlock parameters (pre-transposed: y = x @ W + b;
    # conv weights as (k, in, out) = PyTorch Conv1d weight.transpose)
    params = []
    for _ in range(n_layers):
        params.append(dict(
            wq=nrm((D, n_head * d_k)), bq=nrm((1, n_head * d_k), 0.02),
            wk=nrm((D, n_head * d_k)), bk=nrm((1, n_head * d_k), 0.02),
            wv=nrm((D, n_head * d_k)), bv=nrm((1, n_head * d_k), 0.02),
            wo=nrm((n_head * d_k, D)), bo=nrm((1, D), 0.02),
            ln1_g=jnp.ones((1, D), jnp.float32) + nrm((1, D), 0.02),
            ln1_b=nrm((1, D), 0.02),
            w1=nrm((k1, D, d_inner)), b1=nrm((1, d_inner), 0.02),
            w2=nrm((k2, d_inner, D)), b2=nrm((1, D), 0.02),
            ln2_g=jnp.ones((1, D), jnp.float32) + nrm((1, D), 0.02),
            ln2_b=nrm((1, D), 0.02),
        ))

    stacked = prepare_encoder_params(params, n_head, d_k, k1, k2)

    out = encoder_forward(src_seq, mask, pos_table, stacked,
                          n_head=n_head, d_k=d_k, k1=k1, k2=k2)
    out = jax.block_until_ready(out)

    ref = jax.block_until_ready(
        encoder_ref(src_seq, mask, pos_table, params, n_head, d_k, k1, k2))

    assert out.shape == (B, T, D)
    assert bool(jnp.all(jnp.isfinite(out)))
    max_diff = float(jnp.max(jnp.abs(out - ref)))
    assert max_diff < 2e-2, f"mismatch vs reference: {max_diff}"

    print("KERNEL_OK")
</pallas_src>

<mosaic_0001>
module attributes {stable_mosaic.version = 11 : i64} {
  func.func @encoder_kernel(%arg0: i32, %arg1: i32, %arg2: memref<1x16x32xf32, #tpu.memory_space<vmem>>, %arg3: memref<16x32xf32, #tpu.memory_space<vmem>>, %arg4: memref<1x1x16xf32, #tpu.memory_space<vmem>>, %arg5: memref<1x16x1xf32, #tpu.memory_space<vmem>>, %arg6: memref<1x32x96xbf16, #tpu.memory_space<vmem>>, %arg7: memref<1x1x96xf32, #tpu.memory_space<vmem>>, %arg8: memref<1x32x32xbf16, #tpu.memory_space<vmem>>, %arg9: memref<1x1x32xf32, #tpu.memory_space<vmem>>, %arg10: memref<1x1x32xf32, #tpu.memory_space<vmem>>, %arg11: memref<1x1x32xf32, #tpu.memory_space<vmem>>, %arg12: memref<1x9x32x64xbf16, #tpu.memory_space<vmem>>, %arg13: memref<1x1x64xf32, #tpu.memory_space<vmem>>, %arg14: memref<1x1x64x32xbf16, #tpu.memory_space<vmem>>, %arg15: memref<1x1x32xf32, #tpu.memory_space<vmem>>, %arg16: memref<1x1x32xf32, #tpu.memory_space<vmem>>, %arg17: memref<1x1x32xf32, #tpu.memory_space<vmem>>, %arg18: memref<1x16x32xf32, #tpu.memory_space<vmem>>, %arg19: memref<1x16x32xf32, #tpu.memory_space<vmem>>, %arg20: memref<1x24x32xbf16, #tpu.memory_space<vmem>>) attributes {dimension_semantics = [#tpu.dimension_semantics<parallel>, #tpu.dimension_semantics<arbitrary>], iteration_bounds = array<i64: 2, 2>, scalar_prefetch = 0 : i64, scratch_operands = 2 : i64, tpu.core_type = #tpu.core_type<tc>, window_params = [{transform_indices = @transform_0, window_bounds = array<i64: 1, 16, 32>}, {pipeline_mode = #tpu.pipeline_mode<synchronous>, transform_indices = @transform_1, window_bounds = array<i64: 16, 32>}, {transform_indices = @transform_2, window_bounds = array<i64: 1, 1, 16>}, {transform_indices = @transform_3, window_bounds = array<i64: 1, 16, 1>}, {transform_indices = @transform_4, window_bounds = array<i64: 1, 32, 96>}, {transform_indices = @transform_5, window_bounds = array<i64: 1, 1, 96>}, {transform_indices = @transform_6, window_bounds = array<i64: 1, 32, 32>}, {transform_indices = @transform_7, window_bounds = array<i64: 1, 1, 32>}, {transform_indices = @transform_8, window_bounds = array<i64: 1, 1, 32>}, {transform_indices = @transform_9, window_bounds = array<i64: 1, 1, 32>}, {transform_indices = @transform_10, window_bounds = array<i64: 1, 9, 32, 64>}, {transform_indices = @transform_11, window_bounds = array<i64: 1, 1, 64>}, {transform_indices = @transform_12, window_bounds = array<i64: 1, 1, 64, 32>}, {transform_indices = @transform_13, window_bounds = array<i64: 1, 1, 32>}, {transform_indices = @transform_14, window_bounds = array<i64: 1, 1, 32>}, {transform_indices = @transform_15, window_bounds = array<i64: 1, 1, 32>}, {transform_indices = @transform_16, window_bounds = array<i64: 1, 16, 32>}]} {
    %c0_i32 = arith.constant 0 : i32
    %0 = arith.cmpi eq, %arg1, %c0_i32 : i32
    %1 = arith.extui %0 : i1 to i32
    %c0_i32_0 = arith.constant 0 : i32
    %2 = arith.cmpi ne, %1, %c0_i32_0 : i32
    scf.if %2 {
      %c0_144 = arith.constant 0 : index
      %c0_145 = arith.constant 0 : index
      %c0_146 = arith.constant 0 : index
      %219 = vector.load %arg2[%c0_144, %c0_145, %c0_146] : memref<1x16x32xf32, #tpu.memory_space<vmem>>, vector<1x16x32xf32>
      %c0_147 = arith.constant 0 : index
      %c0_148 = arith.constant 0 : index
      %220 = vector.load %arg3[%c0_147, %c0_148] : memref<16x32xf32, #tpu.memory_space<vmem>>, vector<16x32xf32>
      %221 = vector.shape_cast %220 : vector<16x32xf32> to vector<1x16x32xf32>
      %222 = arith.addf %219, %221 : vector<1x16x32xf32>
      %c0_149 = arith.constant 0 : index
      %c0_150 = arith.constant 0 : index
      %c0_151 = arith.constant 0 : index
      %223 = vector.load %arg19[%c0_149, %c0_150, %c0_151] : memref<1x16x32xf32, #tpu.memory_space<vmem>>, vector<1x16x32xf32>
      tpu.vector_store %arg19[%c0_149, %c0_150, %c0_151], %222 {strides = array<i32>} : memref<1x16x32xf32, #tpu.memory_space<vmem>>, vector<1x16x32xf32>,
    } else {
    }
    %c0 = arith.constant 0 : index
    %c0_1 = arith.constant 0 : index
    %c0_2 = arith.constant 0 : index
    %3 = vector.load %arg4[%c0, %c0_1, %c0_2] : memref<1x1x16xf32, #tpu.memory_space<vmem>>, vector<1x1x16xf32>
    %c0_3 = arith.constant 0 : index
    %c0_4 = arith.constant 0 : index
    %c0_5 = arith.constant 0 : index
    %4 = vector.load %arg5[%c0_3, %c0_4, %c0_5] : memref<1x16x1xf32, #tpu.memory_space<vmem>>, vector<1x16x1xf32>
    %5 = vector.shape_cast %4 : vector<1x16x1xf32> to vector<1x16x1xf32>
    %6 = vector.broadcast %5 : vector<1x16x1xf32> to vector<1x16x32xf32>
    %7 = vector.shape_cast %6 : vector<1x16x32xf32> to vector<16x32xf32>
    %c0_6 = arith.constant 0 : index
    %c0_7 = arith.constant 0 : index
    %c0_8 = arith.constant 0 : index
    %8 = vector.load %arg19[%c0_6, %c0_7, %c0_8] : memref<1x16x32xf32, #tpu.memory_space<vmem>>, vector<1x16x32xf32>
    %9 = vector.shape_cast %8 : vector<1x16x32xf32> to vector<16x32xf32>
    %10 = arith.truncf %9 : vector<16x32xf32> to vector<16x32xbf16>
    %c0_9 = arith.constant 0 : index
    %c0_10 = arith.constant 0 : index
    %c0_11 = arith.constant 0 : index
    %11 = vector.load %arg6[%c0_9, %c0_10, %c0_11] : memref<1x32x96xbf16, #tpu.memory_space<vmem>>, vector<1x32x96xbf16>
    %12 = vector.shape_cast %11 : vector<1x32x96xbf16> to vector<32x96xbf16>
    %cst = arith.constant dense<0.000000e+00> : vector<16x96xf32>
    %13 = tpu.matmul %10, %12, %cst {dimension_numbers = #tpu.dot_dimension_numbers<[1], [0], [0], [1], [0, 0, 1, 1], [], []>} : vector<16x32xbf16>, vector<32x96xbf16>, vector<16x96xf32> -> vector<16x96xf32>
    %c0_12 = arith.constant 0 : index
    %c0_13 = arith.constant 0 : index
    %c0_14 = arith.constant 0 : index
    %14 = vector.load %arg7[%c0_12, %c0_13, %c0_14] : memref<1x1x96xf32, #tpu.memory_space<vmem>>, vector<1x1x96xf32>
    %15 = vector.shape_cast %14 : vector<1x1x96xf32> to vector<1x96xf32>
    %16 = vector.broadcast %15 : vector<1x96xf32> to vector<16x96xf32>
    %17 = arith.addf %13, %16 : vector<16x96xf32>
    %18 = vector.extract_strided_slice %17 {offsets = [0, 0], sizes = [16, 32], strides = [1, 1]} : vector<16x96xf32> to vector<16x32xf32>
    %cst_15 = arith.constant 2.500000e-01 : f32
    %19 = vector.broadcast %cst_15 : f32 to vector<16x32xf32>
    %20 = arith.mulf %18, %19 : vector<16x32xf32>
    %21 = vector.extract_strided_slice %17 {offsets = [0, 32], sizes = [16, 32], strides = [1, 1]} : vector<16x96xf32> to vector<16x32xf32>
    %22 = vector.extract_strided_slice %17 {offsets = [0, 64], sizes = [16, 32], strides = [1, 1]} : vector<16x96xf32> to vector<16x32xf32>
    %23 = vector.extract_strided_slice %20 {offsets = [0, 0], sizes = [16, 16], strides = [1, 1]} : vector<16x32xf32> to vector<16x16xf32>
    %24 = vector.shape_cast %23 : vector<16x16xf32> to vector<1x16x16xf32>
    %25 = vector.extract_strided_slice %21 {offsets = [0, 0], sizes = [16, 16], strides = [1, 1]} : vector<16x32xf32> to vector<16x16xf32>
    %26 = vector.shape_cast %25 : vector<16x16xf32> to vector<1x16x16xf32>
    %27 = vector.extract_strided_slice %22 {offsets = [0, 0], sizes = [16, 16], strides = [1, 1]} : vector<16x32xf32> to vector<16x16xf32>
    %28 = vector.shape_cast %27 : vector<16x16xf32> to vector<1x16x16xf32>
    %29 = arith.truncf %24 : vector<1x16x16xf32> to vector<1x16x16xbf16>
    %30 = arith.truncf %26 : vector<1x16x16xf32> to vector<1x16x16xbf16>
    "tpu.trace_start"() <{level = 10 : i32, message = "bqd,bkd->bqk"}> : () -> ()
    %cst_16 = arith.constant dense<0.000000e+00> : vector<1x16x16xf32>
    %31 = tpu.matmul %29, %30, %cst_16 {dimension_numbers = #tpu.dot_dimension_numbers<[2], [2], [1], [1], [0, 0, 0, 1, 1, 1], [0], [0]>} : vector<1x16x16xbf16>, vector<1x16x16xbf16>, vector<1x16x16xf32> -> vector<1x16x16xf32>
    "tpu.trace_stop"() : () -> ()
    %32 = vector.broadcast %3 : vector<1x1x16xf32> to vector<1x16x16xf32>
    %33 = arith.addf %31, %32 : vector<1x16x16xf32>
    %cst_17 = arith.constant dense<0xFF800000> : vector<1x16xf32>
    %34 = vector.multi_reduction <maximumf>, %33, %cst_17 [2] : vector<1x16x16xf32> to vector<1x16xf32>
    %35 = vector.shape_cast %34 : vector<1x16xf32> to vector<1x16x1xf32>
    %36 = vector.broadcast %35 : vector<1x16x1xf32> to vector<1x16x16xf32>
    %37 = arith.subf %33, %36 : vector<1x16x16xf32>
    %38 = math.exp %37 : vector<1x16x16xf32>
    %cst_18 = arith.constant dense<0.000000e+00> : vector<1x16xf32>
    %39 = vector.multi_reduction <add>, %38, %cst_18 [2] : vector<1x16x16xf32> to vector<1x16xf32>
    %40 = vector.shape_cast %39 : vector<1x16xf32> to vector<1x16x1xf32>
    %41 = tpu.reciprocal %40 {approx = true} : vector<1x16x1xf32> -> vector<1x16x1xf32>
    %42 = vector.broadcast %41 : vector<1x16x1xf32> to vector<1x16x16xf32>
    %43 = arith.mulf %38, %42 : vector<1x16x16xf32>
    %44 = arith.truncf %43 : vector<1x16x16xf32> to vector<1x16x16xbf16>
    %45 = arith.truncf %28 : vector<1x16x16xf32> to vector<1x16x16xbf16>
    "tpu.trace_start"() <{level = 10 : i32, message = "bqk,bkd->bqd"}> : () -> ()
    %cst_19 = arith.constant dense<0.000000e+00> : vector<1x16x16xf32>
    %46 = tpu.matmul %44, %45, %cst_19 {dimension_numbers = #tpu.dot_dimension_numbers<[2], [1], [1], [2], [0, 0, 0, 1, 1, 2], [0], [0]>} : vector<1x16x16xbf16>, vector<1x16x16xbf16>, vector<1x16x16xf32> -> vector<1x16x16xf32>
    "tpu.trace_stop"() : () -> ()
    %47 = vector.shape_cast %46 : vector<1x16x16xf32> to vector<16x16xf32>
    %48 = vector.extract_strided_slice %20 {offsets = [0, 16], sizes = [16, 16], strides = [1, 1]} : vector<16x32xf32> to vector<16x16xf32>
    %49 = vector.shape_cast %48 : vector<16x16xf32> to vector<1x16x16xf32>
    %50 = vector.extract_strided_slice %21 {offsets = [0, 16], sizes = [16, 16], strides = [1, 1]} : vector<16x32xf32> to vector<16x16xf32>
    %51 = vector.shape_cast %50 : vector<16x16xf32> to vector<1x16x16xf32>
    %52 = vector.extract_strided_slice %22 {offsets = [0, 16], sizes = [16, 16], strides = [1, 1]} : vector<16x32xf32> to vector<16x16xf32>
    %53 = vector.shape_cast %52 : vector<16x16xf32> to vector<1x16x16xf32>
    %54 = arith.truncf %49 : vector<1x16x16xf32> to vector<1x16x16xbf16>
    %55 = arith.truncf %51 : vector<1x16x16xf32> to vector<1x16x16xbf16>
    "tpu.trace_start"() <{level = 10 : i32, message = "bqd,bkd->bqk"}> : () -> ()
    %cst_20 = arith.constant dense<0.000000e+00> : vector<1x16x16xf32>
    %56 = tpu.matmul %54, %55, %cst_20 {dimension_numbers = #tpu.dot_dimension_numbers<[2], [2], [1], [1], [0, 0, 0, 1, 1, 1], [0], [0]>} : vector<1x16x16xbf16>, vector<1x16x16xbf16>, vector<1x16x16xf32> -> vector<1x16x16xf32>
    "tpu.trace_stop"() : () -> ()
    %57 = vector.broadcast %3 : vector<1x1x16xf32> to vector<1x16x16xf32>
    %58 = arith.addf %56, %57 : vector<1x16x16xf32>
    %cst_21 = arith.constant dense<0xFF800000> : vector<1x16xf32>
    %59 = vector.multi_reduction <maximumf>, %58, %cst_21 [2] : vector<1x16x16xf32> to vector<1x16xf32>
    %60 = vector.shape_cast %59 : vector<1x16xf32> to vector<1x16x1xf32>
    %61 = vector.broadcast %60 : vector<1x16x1xf32> to vector<1x16x16xf32>
    %62 = arith.subf %58, %61 : vector<1x16x16xf32>
    %63 = math.exp %62 : vector<1x16x16xf32>
    %cst_22 = arith.constant dense<0.000000e+00> : vector<1x16xf32>
    %64 = vector.multi_reduction <add>, %63, %cst_22 [2] : vector<1x16x16xf32> to vector<1x16xf32>
    %65 = vector.shape_cast %64 : vector<1x16xf32> to vector<1x16x1xf32>
    %66 = tpu.reciprocal %65 {approx = true} : vector<1x16x1xf32> -> vector<1x16x1xf32>
    %67 = vector.broadcast %66 : vector<1x16x1xf32> to vector<1x16x16xf32>
    %68 = arith.mulf %63, %67 : vector<1x16x16xf32>
    %69 = arith.truncf %68 : vector<1x16x16xf32> to vector<1x16x16xbf16>
    %70 = arith.truncf %53 : vector<1x16x16xf32> to vector<1x16x16xbf16>
    "tpu.trace_start"() <{level = 10 : i32, message = "bqk,bkd->bqd"}> : () -> ()
    %cst_23 = arith.constant dense<0.000000e+00> : vector<1x16x16xf32>
    %71 = tpu.matmul %69, %70, %cst_23 {dimension_numbers = #tpu.dot_dimension_numbers<[2], [1], [1], [2], [0, 0, 0, 1, 1, 2], [0], [0]>} : vector<1x16x16xbf16>, vector<1x16x16xbf16>, vector<1x16x16xf32> -> vector<1x16x16xf32>
    "tpu.trace_stop"() : () -> ()
    %72 = vector.shape_cast %71 : vector<1x16x16xf32> to vector<16x16xf32>
    %73 = tpu.concatenate %47, %72 in 1 : vector<16x16xf32>, vector<16x16xf32> -> vector<16x32xf32>
    %c0_24 = arith.constant 0 : index
    %c0_25 = arith.constant 0 : index
    %c0_26 = arith.constant 0 : index
    %74 = vector.load %arg8[%c0_24, %c0_25, %c0_26] : memref<1x32x32xbf16, #tpu.memory_space<vmem>>, vector<1x32x32xbf16>
    %75 = vector.shape_cast %74 : vector<1x32x32xbf16> to vector<32x32xbf16>
    %76 = arith.truncf %73 : vector<16x32xf32> to vector<16x32xbf16>
    %cst_27 = arith.constant dense<0.000000e+00> : vector<16x32xf32>
    %77 = tpu.matmul %76, %75, %cst_27 {dimension_numbers = #tpu.dot_dimension_numbers<[1], [0], [0], [1], [0, 0, 1, 1], [], []>} : vector<16x32xbf16>, vector<32x32xbf16>, vector<16x32xf32> -> vector<16x32xf32>
    %c0_28 = arith.constant 0 : index
    %c0_29 = arith.constant 0 : index
    %c0_30 = arith.constant 0 : index
    %78 = vector.load %arg9[%c0_28, %c0_29, %c0_30] : memref<1x1x32xf32, #tpu.memory_space<vmem>>, vector<1x1x32xf32>
    %79 = vector.shape_cast %78 : vector<1x1x32xf32> to vector<1x32xf32>
    %80 = vector.broadcast %79 : vector<1x32xf32> to vector<16x32xf32>
    %81 = arith.addf %77, %80 : vector<16x32xf32>
    %82 = arith.addf %81, %9 : vector<16x32xf32>
    %c0_31 = arith.constant 0 : index
    %c0_32 = arith.constant 0 : index
    %c0_33 = arith.constant 0 : index
    %83 = vector.load %arg10[%c0_31, %c0_32, %c0_33] : memref<1x1x32xf32, #tpu.memory_space<vmem>>, vector<1x1x32xf32>
    %84 = vector.shape_cast %83 : vector<1x1x32xf32> to vector<1x32xf32>
    %c0_34 = arith.constant 0 : index
    %c0_35 = arith.constant 0 : index
    %c0_36 = arith.constant 0 : index
    %85 = vector.load %arg11[%c0_34, %c0_35, %c0_36] : memref<1x1x32xf32, #tpu.memory_space<vmem>>, vector<1x1x32xf32>
    %86 = vector.shape_cast %85 : vector<1x1x32xf32> to vector<1x32xf32>
    %cst_37 = arith.constant dense<0.000000e+00> : vector<16xf32>
    %87 = vector.multi_reduction <add>, %82, %cst_37 [1] : vector<16x32xf32> to vector<16xf32>
    %88 = vector.shape_cast %87 : vector<16xf32> to vector<16x1xf32>
    %cst_38 = arith.constant 3.200000e+01 : f32
    %89 = vector.broadcast %cst_38 : f32 to vector<16x1xf32>
    %90 = arith.divf %88, %89 : vector<16x1xf32>
    %91 = vector.broadcast %90 : vector<16x1xf32> to vector<16x32xf32>
    %92 = arith.subf %82, %91 : vector<16x32xf32>
    %93 = arith.mulf %92, %92 : vector<16x32xf32>
    %cst_39 = arith.constant dense<0.000000e+00> : vector<16xf32>
    %94 = vector.multi_reduction <add>, %93, %cst_39 [1] : vector<16x32xf32> to vector<16xf32>
    %95 = vector.shape_cast %94 : vector<16xf32> to vector<16x1xf32>
    %cst_40 = arith.constant 3.200000e+01 : f32
    %96 = vector.broadcast %cst_40 : f32 to vector<16x1xf32>
    %97 = arith.divf %95, %96 : vector<16x1xf32>
    %98 = vector.broadcast %90 : vector<16x1xf32> to vector<16x32xf32>
    %99 = arith.subf %82, %98 : vector<16x32xf32>
    %cst_41 = arith.constant 9.99999974E-6 : f32
    %100 = vector.broadcast %cst_41 : f32 to vector<16x1xf32>
    %101 = arith.addf %97, %100 : vector<16x1xf32>
    %102 = math.rsqrt %101 : vector<16x1xf32>
    %103 = vector.broadcast %102 : vector<16x1xf32> to vector<16x32xf32>
    %104 = arith.mulf %99, %103 : vector<16x32xf32>
    %105 = vector.broadcast %84 : vector<1x32xf32> to vector<16x32xf32>
    %106 = arith.mulf %104, %105 : vector<16x32xf32>
    %107 = vector.broadcast %86 : vector<1x32xf32> to vector<16x32xf32>
    %108 = arith.addf %106, %107 : vector<16x32xf32>
    %109 = arith.mulf %108, %7 : vector<16x32xf32>
    %c0_42 = arith.constant 0 : index
    %c0_43 = arith.constant 0 : index
    %c0_44 = arith.constant 0 : index
    %110 = vector.load %arg13[%c0_42, %c0_43, %c0_44] : memref<1x1x64xf32, #tpu.memory_space<vmem>>, vector<1x1x64xf32>
    %111 = vector.shape_cast %110 : vector<1x1x64xf32> to vector<1x64xf32>
    %112 = arith.truncf %109 : vector<16x32xf32> to vector<16x32xbf16>
    %cst_45 = arith.constant 0.000000e+00 : bf16
    %113 = vector.broadcast %cst_45 : bf16 to vector<1x4x32xbf16>
    %c0_46 = arith.constant 0 : index
    %c0_47 = arith.constant 0 : index
    %c0_48 = arith.constant 0 : index
    %114 = vector.load %arg20[%c0_46, %c0_47, %c0_48] : memref<1x24x32xbf16, #tpu.memory_space<vmem>>, vector<1x4x32xbf16>
    tpu.vector_store %arg20[%c0_46, %c0_47, %c0_48], %113 {strides = array<i32>} : memref<1x24x32xbf16, #tpu.memory_space<vmem>>, vector<1x4x32xbf16>,
    %cst_49 = arith.constant 0.000000e+00 : bf16
    %115 = vector.broadcast %cst_49 : bf16 to vector<1x4x32xbf16>
    %c0_50 = arith.constant 0 : index
    %c20 = arith.constant 20 : index
    %c0_51 = arith.constant 0 : index
    %116 = vector.load %arg20[%c0_50, %c20, %c0_51] : memref<1x24x32xbf16, #tpu.memory_space<vmem>>, vector<1x4x32xbf16>
    tpu.vector_store %arg20[%c0_50, %c20, %c0_51], %115 {strides = array<i32>} : memref<1x24x32xbf16, #tpu.memory_space<vmem>>, vector<1x4x32xbf16>,
    %117 = vector.shape_cast %112 : vector<16x32xbf16> to vector<1x16x32xbf16>
    %c0_52 = arith.constant 0 : index
    %c4 = arith.constant 4 : index
    %c0_53 = arith.constant 0 : index
    %118 = vector.load %arg20[%c0_52, %c4, %c0_53] : memref<1x24x32xbf16, #tpu.memory_space<vmem>>, vector<1x16x32xbf16>
    tpu.vector_store %arg20[%c0_52, %c4, %c0_53], %117 {strides = array<i32>} : memref<1x24x32xbf16, #tpu.memory_space<vmem>>, vector<1x16x32xbf16>,
    %cst_54 = arith.constant 0.000000e+00 : f32
    %119 = vector.broadcast %cst_54 : f32 to vector<16x64xf32>
    %120 = vector.broadcast %111 : vector<1x64xf32> to vector<16x64xf32>
    %121 = arith.addf %119, %120 : vector<16x64xf32>
    %c0_55 = arith.constant 0 : index
    %c0_56 = arith.constant 0 : index
    %c0_57 = arith.constant 0 : index
    %122 = vector.load %arg20[%c0_55, %c0_56, %c0_57] : memref<1x24x32xbf16, #tpu.memory_space<vmem>>, vector<1x16x32xbf16>
    %123 = vector.shape_cast %122 : vector<1x16x32xbf16> to vector<16x32xbf16>
    %c0_58 = arith.constant 0 : index
    %c0_59 = arith.constant 0 : index
    %c0_60 = arith.constant 0 : index
    %c0_61 = arith.constant 0 : index
    %124 = vector.load %arg12[%c0_58, %c0_59, %c0_60, %c0_61] : memref<1x9x32x64xbf16, #tpu.memory_space<vmem>>, vector<1x1x32x64xbf16>
    %125 = vector.shape_cast %124 : vector<1x1x32x64xbf16> to vector<32x64xbf16>
    %cst_62 = arith.constant dense<0.000000e+00> : vector<16x64xf32>
    %126 = tpu.matmul %123, %125, %cst_62 {dimension_numbers = #tpu.dot_dimension_numbers<[1], [0], [0], [1], [0, 0, 1, 1], [], []>} : vector<16x32xbf16>, vector<32x64xbf16>, vector<16x64xf32> -> vector<16x64xf32>
    %127 = arith.addf %121, %126 : vector<16x64xf32>
    %c0_63 = arith.constant 0 : index
    %c1 = arith.constant 1 : index
    %c0_64 = arith.constant 0 : index
    %128 = vector.load %arg20[%c0_63, %c1, %c0_64] : memref<1x24x32xbf16, #tpu.memory_space<vmem>>, vector<1x16x32xbf16>
    %129 = vector.shape_cast %128 : vector<1x16x32xbf16> to vector<16x32xbf16>
    %c0_65 = arith.constant 0 : index
    %c1_66 = arith.constant 1 : index
    %c0_67 = arith.constant 0 : index
    %c0_68 = arith.constant 0 : index
    %130 = vector.load %arg12[%c0_65, %c1_66, %c0_67, %c0_68] : memref<1x9x32x64xbf16, #tpu.memory_space<vmem>>, vector<1x1x32x64xbf16>
    %131 = vector.shape_cast %130 : vector<1x1x32x64xbf16> to vector<32x64xbf16>
    %cst_69 = arith.constant dense<0.000000e+00> : vector<16x64xf32>
    %132 = tpu.matmul %129, %131, %cst_69 {dimension_numbers = #tpu.dot_dimension_numbers<[1], [0], [0], [1], [0, 0, 1, 1], [], []>} : vector<16x32xbf16>, vector<32x64xbf16>, vector<16x64xf32> -> vector<16x64xf32>
    %133 = arith.addf %127, %132 : vector<16x64xf32>
    %c0_70 = arith.constant 0 : index
    %c2 = arith.constant 2 : index
    %c0_71 = arith.constant 0 : index
    %134 = vector.load %arg20[%c0_70, %c2, %c0_71] : memref<1x24x32xbf16, #tpu.memory_space<vmem>>, vector<1x16x32xbf16>
    %135 = vector.shape_cast %134 : vector<1x16x32xbf16> to vector<16x32xbf16>
    %c0_72 = arith.constant 0 : index
    %c2_73 = arith.constant 2 : index
    %c0_74 = arith.constant 0 : index
    %c0_75 = arith.constant 0 : index
    %136 = vector.load %arg12[%c0_72, %c2_73, %c0_74, %c0_75] : memref<1x9x32x64xbf16, #tpu.memory_space<vmem>>, vector<1x1x32x64xbf16>
    %137 = vector.shape_cast %136 : vector<1x1x32x64xbf16> to vector<32x64xbf16>
    %cst_76 = arith.constant dense<0.000000e+00> : vector<16x64xf32>
    %138 = tpu.matmul %135, %137, %cst_76 {dimension_numbers = #tpu.dot_dimension_numbers<[1], [0], [0], [1], [0, 0, 1, 1], [], []>} : vector<16x32xbf16>, vector<32x64xbf16>, vector<16x64xf32> -> vector<16x64xf32>
    %139 = arith.addf %133, %138 : vector<16x64xf32>
    %c0_77 = arith.constant 0 : index
    %c3 = arith.constant 3 : index
    %c0_78 = arith.constant 0 : index
    %140 = vector.load %arg20[%c0_77, %c3, %c0_78] : memref<1x24x32xbf16, #tpu.memory_space<vmem>>, vector<1x16x32xbf16>
    %141 = vector.shape_cast %140 : vector<1x16x32xbf16> to vector<16x32xbf16>
    %c0_79 = arith.constant 0 : index
    %c3_80 = arith.constant 3 : index
    %c0_81 = arith.constant 0 : index
    %c0_82 = arith.constant 0 : index
    %142 = vector.load %arg12[%c0_79, %c3_80, %c0_81, %c0_82] : memref<1x9x32x64xbf16, #tpu.memory_space<vmem>>, vector<1x1x32x64xbf16>
    %143 = vector.shape_cast %142 : vector<1x1x32x64xbf16> to vector<32x64xbf16>
    %cst_83 = arith.constant dense<0.000000e+00> : vector<16x64xf32>
    %144 = tpu.matmul %141, %143, %cst_83 {dimension_numbers = #tpu.dot_dimension_numbers<[1], [0], [0], [1], [0, 0, 1, 1], [], []>} : vector<16x32xbf16>, vector<32x64xbf16>, vector<16x64xf32> -> vector<16x64xf32>
    %145 = arith.addf %139, %144 : vector<16x64xf32>
    %c0_84 = arith.constant 0 : index
    %c4_85 = arith.constant 4 : index
    %c0_86 = arith.constant 0 : index
    %146 = vector.load %arg20[%c0_84, %c4_85, %c0_86] : memref<1x24x32xbf16, #tpu.memory_space<vmem>>, vector<1x16x32xbf16>
    %147 = vector.shape_cast %146 : vector<1x16x32xbf16> to vector<16x32xbf16>
    %c0_87 = arith.constant 0 : index
    %c4_88 = arith.constant 4 : index
    %c0_89 = arith.constant 0 : index
    %c0_90 = arith.constant 0 : index
    %148 = vector.load %arg12[%c0_87, %c4_88, %c0_89, %c0_90] : memref<1x9x32x64xbf16, #tpu.memory_space<vmem>>, vector<1x1x32x64xbf16>
    %149 = vector.shape_cast %148 : vector<1x1x32x64xbf16> to vector<32x64xbf16>
    %cst_91 = arith.constant dense<0.000000e+00> : vector<16x64xf32>
    %150 = tpu.matmul %147, %149, %cst_91 {dimension_numbers = #tpu.dot_dimension_numbers<[1], [0], [0], [1], [0, 0, 1, 1], [], []>} : vector<16x32xbf16>, vector<32x64xbf16>, vector<16x64xf32> -> vector<16x64xf32>
    %151 = arith.addf %145, %150 : vector<16x64xf32>
    %c0_92 = arith.constant 0 : index
    %c5 = arith.constant 5 : index
    %c0_93 = arith.constant 0 : index
    %152 = vector.load %arg20[%c0_92, %c5, %c0_93] : memref<1x24x32xbf16, #tpu.memory_space<vmem>>, vector<1x16x32xbf16>
    %153 = vector.shape_cast %152 : vector<1x16x32xbf16> to vector<16x32xbf16>
    %c0_94 = arith.constant 0 : index
    %c5_95 = arith.constant 5 : index
    %c0_96 = arith.constant 0 : index
    %c0_97 = arith.constant 0 : index
    %154 = vector.load %arg12[%c0_94, %c5_95, %c0_96, %c0_97] : memref<1x9x32x64xbf16, #tpu.memory_space<vmem>>, vector<1x1x32x64xbf16>
    %155 = vector.shape_cast %154 : vector<1x1x32x64xbf16> to vector<32x64xbf16>
    %cst_98 = arith.constant dense<0.000000e+00> : vector<16x64xf32>
    %156 = tpu.matmul %153, %155, %cst_98 {dimension_numbers = #tpu.dot_dimension_numbers<[1], [0], [0], [1], [0, 0, 1, 1], [], []>} : vector<16x32xbf16>, vector<32x64xbf16>, vector<16x64xf32> -> vector<16x64xf32>
    %157 = arith.addf %151, %156 : vector<16x64xf32>
    %c0_99 = arith.constant 0 : index
    %c6 = arith.constant 6 : index
    %c0_100 = arith.constant 0 : index
    %158 = vector.load %arg20[%c0_99, %c6, %c0_100] : memref<1x24x32xbf16, #tpu.memory_space<vmem>>, vector<1x16x32xbf16>
    %159 = vector.shape_cast %158 : vector<1x16x32xbf16> to vector<16x32xbf16>
    %c0_101 = arith.constant 0 : index
    %c6_102 = arith.constant 6 : index
    %c0_103 = arith.constant 0 : index
    %c0_104 = arith.constant 0 : index
    %160 = vector.load %arg12[%c0_101, %c6_102, %c0_103, %c0_104] : memref<1x9x32x64xbf16, #tpu.memory_space<vmem>>, vector<1x1x32x64xbf16>
    %161 = vector.shape_cast %160 : vector<1x1x32x64xbf16> to vector<32x64xbf16>
    %cst_105 = arith.constant dense<0.000000e+00> : vector<16x64xf32>
    %162 = tpu.matmul %159, %161, %cst_105 {dimension_numbers = #tpu.dot_dimension_numbers<[1], [0], [0], [1], [0, 0, 1, 1], [], []>} : vector<16x32xbf16>, vector<32x64xbf16>, vector<16x64xf32> -> vector<16x64xf32>
    %163 = arith.addf %157, %162 : vector<16x64xf32>
    %c0_106 = arith.constant 0 : index
    %c7 = arith.constant 7 : index
    %c0_107 = arith.constant 0 : index
    %164 = vector.load %arg20[%c0_106, %c7, %c0_107] : memref<1x24x32xbf16, #tpu.memory_space<vmem>>, vector<1x16x32xbf16>
    %165 = vector.shape_cast %164 : vector<1x16x32xbf16> to vector<16x32xbf16>
    %c0_108 = arith.constant 0 : index
    %c7_109 = arith.constant 7 : index
    %c0_110 = arith.constant 0 : index
    %c0_111 = arith.constant 0 : index
    %166 = vector.load %arg12[%c0_108, %c7_109, %c0_110, %c0_111] : memref<1x9x32x64xbf16, #tpu.memory_space<vmem>>, vector<1x1x32x64xbf16>
    %167 = vector.shape_cast %166 : vector<1x1x32x64xbf16> to vector<32x64xbf16>
    %cst_112 = arith.constant dense<0.000000e+00> : vector<16x64xf32>
    %168 = tpu.matmul %165, %167, %cst_112 {dimension_numbers = #tpu.dot_dimension_numbers<[1], [0], [0], [1], [0, 0, 1, 1], [], []>} : vector<16x32xbf16>, vector<32x64xbf16>, vector<16x64xf32> -> vector<16x64xf32>
    %169 = arith.addf %163, %168 : vector<16x64xf32>
    %c0_113 = arith.constant 0 : index
    %c8 = arith.constant 8 : index
    %c0_114 = arith.constant 0 : index
    %170 = vector.load %arg20[%c0_113, %c8, %c0_114] : memref<1x24x32xbf16, #tpu.memory_space<vmem>>, vector<1x16x32xbf16>
    %171 = vector.shape_cast %170 : vector<1x16x32xbf16> to vector<16x32xbf16>
    %c0_115 = arith.constant 0 : index
    %c8_116 = arith.constant 8 : index
    %c0_117 = arith.constant 0 : index
    %c0_118 = arith.constant 0 : index
    %172 = vector.load %arg12[%c0_115, %c8_116, %c0_117, %c0_118] : memref<1x9x32x64xbf16, #tpu.memory_space<vmem>>, vector<1x1x32x64xbf16>
    %173 = vector.shape_cast %172 : vector<1x1x32x64xbf16> to vector<32x64xbf16>
    %cst_119 = arith.constant dense<0.000000e+00> : vector<16x64xf32>
    %174 = tpu.matmul %171, %173, %cst_119 {dimension_numbers = #tpu.dot_dimension_numbers<[1], [0], [0], [1], [0, 0, 1, 1], [], []>} : vector<16x32xbf16>, vector<32x64xbf16>, vector<16x64xf32> -> vector<16x64xf32>
    %175 = arith.addf %169, %174 : vector<16x64xf32>
    %cst_120 = arith.constant 0.000000e+00 : f32
    %176 = vector.broadcast %cst_120 : f32 to vector<16x64xf32>
    %177 = arith.maximumf %175, %176 : vector<16x64xf32>
    %c0_121 = arith.constant 0 : index
    %c0_122 = arith.constant 0 : index
    %c0_123 = arith.constant 0 : index
    %178 = vector.load %arg15[%c0_121, %c0_122, %c0_123] : memref<1x1x32xf32, #tpu.memory_space<vmem>>, vector<1x1x32xf32>
    %179 = vector.shape_cast %178 : vector<1x1x32xf32> to vector<1x32xf32>
    %180 = arith.truncf %177 : vector<16x64xf32> to vector<16x64xbf16>
    %c0_124 = arith.constant 0 : index
    %c0_125 = arith.constant 0 : index
    %c0_126 = arith.constant 0 : index
    %c0_127 = arith.constant 0 : index
    %181 = vector.load %arg14[%c0_124, %c0_125, %c0_126, %c0_127] : memref<1x1x64x32xbf16, #tpu.memory_space<vmem>>, vector<1x1x64x32xbf16>
    %182 = vector.shape_cast %181 : vector<1x1x64x32xbf16> to vector<64x32xbf16>
    %cst_128 = arith.constant dense<0.000000e+00> : vector<16x32xf32>
    %183 = tpu.matmul %180, %182, %cst_128 {dimension_numbers = #tpu.dot_dimension_numbers<[1], [0], [0], [1], [0, 0, 1, 1], [], []>} : vector<16x64xbf16>, vector<64x32xbf16>, vector<16x32xf32> -> vector<16x32xf32>
    %184 = vector.broadcast %179 : vector<1x32xf32> to vector<16x32xf32>
    %185 = arith.addf %183, %184 : vector<16x32xf32>
    %186 = arith.addf %185, %109 : vector<16x32xf32>
    %c0_129 = arith.constant 0 : index
    %c0_130 = arith.constant 0 : index
    %c0_131 = arith.constant 0 : index
    %187 = vector.load %arg16[%c0_129, %c0_130, %c0_131] : memref<1x1x32xf32, #tpu.memory_space<vmem>>, vector<1x1x32xf32>
    %188 = vector.shape_cast %187 : vector<1x1x32xf32> to vector<1x32xf32>
    %c0_132 = arith.constant 0 : index
    %c0_133 = arith.constant 0 : index
    %c0_134 = arith.constant 0 : index
    %189 = vector.load %arg17[%c0_132, %c0_133, %c0_134] : memref<1x1x32xf32, #tpu.memory_space<vmem>>, vector<1x1x32xf32>
    %190 = vector.shape_cast %189 : vector<1x1x32xf32> to vector<1x32xf32>
    %cst_135 = arith.constant dense<0.000000e+00> : vector<16xf32>
    %191 = vector.multi_reduction <add>, %186, %cst_135 [1] : vector<16x32xf32> to vector<16xf32>
    %192 = vector.shape_cast %191 : vector<16xf32> to vector<16x1xf32>
    %cst_136 = arith.constant 3.200000e+01 : f32
    %193 = vector.broadcast %cst_136 : f32 to vector<16x1xf32>
    %194 = arith.divf %192, %193 : vector<16x1xf32>
    %195 = vector.broadcast %194 : vector<16x1xf32> to vector<16x32xf32>
    %196 = arith.subf %186, %195 : vector<16x32xf32>
    %197 = arith.mulf %196, %196 : vector<16x32xf32>
    %cst_137 = arith.constant dense<0.000000e+00> : vector<16xf32>
    %198 = vector.multi_reduction <add>, %197, %cst_137 [1] : vector<16x32xf32> to vector<16xf32>
    %199 = vector.shape_cast %198 : vector<16xf32> to vector<16x1xf32>
    %cst_138 = arith.constant 3.200000e+01 : f32
    %200 = vector.broadcast %cst_138 : f32 to vector<16x1xf32>
    %201 = arith.divf %199, %200 : vector<16x1xf32>
    %202 = vector.broadcast %194 : vector<16x1xf32> to vector<16x32xf32>
    %203 = arith.subf %186, %202 : vector<16x32xf32>
    %cst_139 = arith.constant 9.99999974E-6 : f32
    %204 = vector.broadcast %cst_139 : f32 to vector<16x1xf32>
    %205 = arith.addf %201, %204 : vector<16x1xf32>
    %206 = math.rsqrt %205 : vector<16x1xf32>
    %207 = vector.broadcast %206 : vector<16x1xf32> to vector<16x32xf32>
    %208 = arith.mulf %203, %207 : vector<16x32xf32>
    %209 = vector.broadcast %188 : vector<1x32xf32> to vector<16x32xf32>
    %210 = arith.mulf %208, %209 : vector<16x32xf32>
    %211 = vector.broadcast %190 : vector<1x32xf32> to vector<16x32xf32>
    %212 = arith.addf %210, %211 : vector<16x32xf32>
    %213 = arith.mulf %212, %7 : vector<16x32xf32>
    %214 = vector.shape_cast %213 : vector<16x32xf32> to vector<1x16x32xf32>
    %c0_140 = arith.constant 0 : index
    %c0_141 = arith.constant 0 : index
    %c0_142 = arith.constant 0 : index
    %215 = vector.load %arg19[%c0_140, %c0_141, %c0_142] : memref<1x16x32xf32, #tpu.memory_space<vmem>>, vector<1x16x32xf32>
    tpu.vector_store %arg19[%c0_140, %c0_141, %c0_142], %214 {strides = array<i32>} : memref<1x16x32xf32, #tpu.memory_space<vmem>>, vector<1x16x32xf32>,
    %c1_i32 = arith.constant 1 : i32
    %216 = arith.cmpi eq, %arg1, %c1_i32 : i32
    %217 = arith.extui %216 : i1 to i32
    %c0_i32_143 = arith.constant 0 : i32
    %218 = arith.cmpi ne, %217, %c0_i32_143 : i32
    scf.if %218 {
      %c0_144 = arith.constant 0 : index
      %c0_145 = arith.constant 0 : index
      %c0_146 = arith.constant 0 : index
      %219 = vector.load %arg19[%c0_144, %c0_145, %c0_146] : memref<1x16x32xf32, #tpu.memory_space<vmem>>, vector<1x16x32xf32>
      %c0_147 = arith.constant 0 : index
      %c0_148 = arith.constant 0 : index
      %c0_149 = arith.constant 0 : index
      %220 = vector.load %arg18[%c0_147, %c0_148, %c0_149] : memref<1x16x32xf32, #tpu.memory_space<vmem>>, vector<1x16x32xf32>
      tpu.vector_store %arg18[%c0_147, %c0_148, %c0_149], %219 {strides = array<i32>} : memref<1x16x32xf32, #tpu.memory_space<vmem>>, vector<1x16x32xf32>,
    } else {
    }
    return
  }
  func.func @transform_0(%arg0: i32, %arg1: i32) -> (i32, i32, i32) {
    %c0_i32 = arith.constant 0 : i32
    %c0_i32_0 = arith.constant 0 : i32
    %c0_i32_1 = arith.constant 0 : i32
    return %arg0, %c0_i32, %c0_i32_0 : i32, i32, i32
  }
  func.func @transform_1(%arg0: i32, %arg1: i32) -> (i32, i32) {
    %c0_i32 = arith.constant 0 : i32
    %c0_i32_0 = arith.constant 0 : i32
    %c0_i32_1 = arith.constant 0 : i32
    return %c0_i32, %c0_i32_0 : i32, i32
  }
  func.func @transform_2(%arg0: i32, %arg1: i32) -> (i32, i32, i32) {
    %c0_i32 = arith.constant 0 : i32
    %c0_i32_0 = arith.constant 0 : i32
    %c0_i32_1 = arith.constant 0 : i32
    return %arg0, %c0_i32, %c0_i32_0 : i32, i32, i32
  }
  func.func @transform_3(%arg0: i32, %arg1: i32) -> (i32, i32, i32) {
    %c0_i32 = arith.constant 0 : i32
    %c0_i32_0 = arith.constant 0 : i32
    %c0_i32_1 = arith.constant 0 : i32
    return %arg0, %c0_i32, %c0_i32_0 : i32, i32, i32
  }
  func.func @transform_4(%arg0: i32, %arg1: i32) -> (i32, i32, i32) {
    %c0_i32 = arith.constant 0 : i32
    %c0_i32_0 = arith.constant 0 : i32
    %c0_i32_1 = arith.constant 0 : i32
    return %arg1, %c0_i32, %c0_i32_0 : i32, i32, i32
  }
  func.func @transform_5(%arg0: i32, %arg1: i32) -> (i32, i32, i32) {
    %c0_i32 = arith.constant 0 : i32
    %c0_i32_0 = arith.constant 0 : i32
    %c0_i32_1 = arith.constant 0 : i32
    return %arg1, %c0_i32, %c0_i32_0 : i32, i32, i32
  }
  func.func @transform_6(%arg0: i32, %arg1: i32) -> (i32, i32, i32) {
    %c0_i32 = arith.constant 0 : i32
    %c0_i32_0 = arith.constant 0 : i32
    %c0_i32_1 = arith.constant 0 : i32
    return %arg1, %c0_i32, %c0_i32_0 : i32, i32, i32
  }
  func.func @transform_7(%arg0: i32, %arg1: i32) -> (i32, i32, i32) {
    %c0_i32 = arith.constant 0 : i32
    %c0_i32_0 = arith.constant 0 : i32
    %c0_i32_1 = arith.constant 0 : i32
    return %arg1, %c0_i32, %c0_i32_0 : i32, i32, i32
  }
  func.func @transform_8(%arg0: i32, %arg1: i32) -> (i32, i32, i32) {
    %c0_i32 = arith.constant 0 : i32
    %c0_i32_0 = arith.constant 0 : i32
    %c0_i32_1 = arith.constant 0 : i32
    return %arg1, %c0_i32, %c0_i32_0 : i32, i32, i32
  }
  func.func @transform_9(%arg0: i32, %arg1: i32) -> (i32, i32, i32) {
    %c0_i32 = arith.constant 0 : i32
    %c0_i32_0 = arith.constant 0 : i32
    %c0_i32_1 = arith.constant 0 : i32
    return %arg1, %c0_i32, %c0_i32_0 : i32, i32, i32
  }
  func.func @transform_10(%arg0: i32, %arg1: i32) -> (i32, i32, i32, i32) {
    %c0_i32 = arith.constant 0 : i32
    %c0_i32_0 = arith.constant 0 : i32
    %c0_i32_1 = arith.constant 0 : i32
    %c0_i32_2 = arith.constant 0 : i32
    return %arg1, %c0_i32, %c0_i32_0, %c0_i32_1 : i32, i32, i32, i32
  }
  func.func @transform_11(%arg0: i32, %arg1: i32) -> (i32, i32, i32) {
    %c0_i32 = arith.constant 0 : i32
    %c0_i32_0 = arith.constant 0 : i32
    %c0_i32_1 = arith.constant 0 : i32
    return %arg1, %c0_i32, %c0_i32_0 : i32, i32, i32
  }
  func.func @transform_12(%arg0: i32, %arg1: i32) -> (i32, i32, i32, i32) {
    %c0_i32 = arith.constant 0 : i32
    %c0_i32_0 = arith.constant 0 : i32
    %c0_i32_1 = arith.constant 0 : i32
    %c0_i32_2 = arith.constant 0 : i32
    return %arg1, %c0_i32, %c0_i32_0, %c0_i32_1 : i32, i32, i32, i32
  }
  func.func @transform_13(%arg0: i32, %arg1: i32) -> (i32, i32, i32) {
    %c0_i32 = arith.constant 0 : i32
    %c0_i32_0 = arith.constant 0 : i32
    %c0_i32_1 = arith.constant 0 : i32
    return %arg1, %c0_i32, %c0_i32_0 : i32, i32, i32
  }
  func.func @transform_14(%arg0: i32, %arg1: i32) -> (i32, i32, i32) {
    %c0_i32 = arith.constant 0 : i32
    %c0_i32_0 = arith.constant 0 : i32
    %c0_i32_1 = arith.constant 0 : i32
    return %arg1, %c0_i32, %c0_i32_0 : i32, i32, i32
  }
  func.func @transform_15(%arg0: i32, %arg1: i32) -> (i32, i32, i32) {
    %c0_i32 = arith.constant 0 : i32
    %c0_i32_0 = arith.constant 0 : i32
    %c0_i32_1 = arith.constant 0 : i32
    return %arg1, %c0_i32, %c0_i32_0 : i32, i32, i32
  }
  func.func @transform_16(%arg0: i32, %arg1: i32) -> (i32, i32, i32) {
    %c0_i32 = arith.constant 0 : i32
    %c0_i32_0 = arith.constant 0 : i32
    %c0_i32_1 = arith.constant 0 : i32
    return %arg0, %c0_i32, %c0_i32_0 : i32, i32, i32
  }
}

</mosaic_0001>

<bundles_post_ra>
// kernel: tpu_custom_call.1
= control target key start
LH: loop header
LB: loop body
LE: loop exit
PB: predicated region body
PF: predicated region fallthrough
CT: control target
= control target key end

     0   :  { %s3261_s0 = inlined_call_operand.vmem [shape: f32[2,16,32], index: 0, kind: input, shape index: {}]   ;;  %s3262_s1 = inlined_call_operand.hbm [shape: f32[16,32], index: 1, kind: input, shape index: {}]   ;;  %s3263_s2 = inlined_call_operand.vmem [shape: f32[2,1,16], index: 2, kind: input, shape index: {}]   ;;  %s3264_s3 = inlined_call_operand.vmem [shape: f32[2,16,1], index: 3, kind: input, shape index: {}]   ;;  %s3265_s4 = inlined_call_operand.vmem [shape: bf16[2,32,96], index: 4, kind: input, shape index: {}]   ;;  %s3266_s5 = inlined_call_operand.vmem [shape: f32[2,1,96], index: 5, kind: input, shape index: {}]   ;;  %s3267_s6 = inlined_call_operand.vmem [shape: bf16[2,32,32], index: 6, kind: input, shape index: {}]   ;;  %s3268_s7 = inlined_call_operand.vmem [shape: f32[2,1,32], index: 7, kind: input, shape index: {}]   ;;  %s3269_s8 = inlined_call_operand.vmem [shape: f32[2,1,32], index: 8, kind: input, shape index: {}]   ;;  %s3270_s9 = inlined_call_operand.vmem [shape: f32[2,1,32], index: 9, kind: input, shape index: {}]   ;;  %s3271_s10 = inlined_call_operand.hbm [shape: bf16[2,9,32,64], index: 10, kind: input, shape index: {}]   ;;  %s3272_s11 = inlined_call_operand.vmem [shape: f32[2,1,64], index: 11, kind: input, shape index: {}]   ;;  %s3273_s12 = inlined_call_operand.vmem [shape: bf16[2,1,64,32], index: 12, kind: input, shape index: {}]   ;;  %s3274_s13 = inlined_call_operand.hbm [shape: f32[2,1,32], index: 13, kind: input, shape index: {}]   ;;  %s3275_s14 = inlined_call_operand.vmem [shape: f32[2,1,32], index: 14, kind: input, shape index: {}]   ;;  %s3276_s15 = inlined_call_operand.hbm [shape: f32[2,1,32], index: 15, kind: input, shape index: {}]   ;;  %s3277_s16 = inlined_call_operand.hbm [shape: f32[2,16,32], index: 16, kind: output, shape index: {}]  }
   0x1   :  { %3299 = sst [smem:[#allocation35_spill]] %s3261_s0 }
   0x2   :  { %3300 = sst [smem:[#allocation36_spill]] %s3262_s1 }
   0x3   :  { %3301 = sst [smem:[#allocation37_spill]] %s3264_s3 }
   0x4   :  { %3302 = sst [smem:[#allocation38_spill]] %s3265_s4 }
   0x5   :  { %3303 = sst [smem:[#allocation39_spill]] %s3267_s6 }
   0x6   :  { %3304 = sst [smem:[#allocation40_spill]] %s3268_s7 }
   0x7   :  { %3305 = sst [smem:[#allocation41_spill]] %s3269_s8 }
   0x8   :  { %3306 = sst [smem:[#allocation42_spill]] %s3270_s9 }
   0x9   :  { %3307 = sst [smem:[#allocation43_spill]] %s3271_s10 }
   0xa   :  { %3308 = sst [smem:[#allocation44_spill]] %s3272_s11 }
   0xb   :  { %3309 = sst [smem:[#allocation45_spill]] %s3273_s12 }
   0xc   :  { %3310 = sst [smem:[#allocation46_spill]] %s3274_s13 }
   0xd   :  { %3311 = sst [smem:[#allocation47_spill]] %s3275_s14 }
   0xe   :  { %3312 = sst [smem:[#allocation48_spill]] %s3276_s15 }
   0xf   :  { %3313 = sst [smem:[#allocation49_spill]] %s3277_s16 }
  0x10   :  { %21 = vsyncpa [#allocation5], 0 }
  0x11   :  { %22 = vsyncpa [#allocation8], 0 }
  0x12   :  { %24 = vsyncpa [#allocation8 + $0x1], 0 }
  0x13   :  { %25 = vsyncpa [#allocation11], 0 }
  0x14   :  { %27 = vsyncpa [#allocation11 + $0x1], 0 }
  0x15   :  { %28 = vsyncpa [#allocation6], 0 }
  0x16   :  { %30 = vsyncpa [#allocation6 + $0x1], 0  ;;  %s2806_s21 = smov 0   ;;  %s2808_s22 = smov 0  }
  0x17   :  { %s2810_s23 = smov 0   ;;  %s2812_s24 = smov 0  }
  0x18   :  { %s2814_s25 = smov 0   ;;  %s2816_s26 = smov 0  }
  0x19   :  { %s2818_s27 = smov 0   ;;  %s2820_s28 = smov 0  }
  0x1a   :  { %s2822_s29 = smov 0   ;;  %s2824_s30 = smov 0  }
  0x1b   :  { %s2826_s0 = smov 0  }
  0x1c LB: > { %3314 = sst [smem:[#allocation17_spill]] %s2664_s21  ;;  %s45_s17 = sadd.s32 1, %s2696_s29  ;;  %s2704_s0 = sphi %s2826_s0, %s36_s0   ;;  %s2700_s30 = sphi %s2824_s30, %s3380_s30   ;;  %s2696_s29 = sphi %s2822_s29, %s3379_s29   ;;  %s2692_s28 = sphi %s2820_s28, %s3378_s28   ;;  %s2688_s27 = sphi %s2818_s27, %s3377_s27   ;;  %s2684_s26 = sphi %s2816_s26, %s3376_s26   ;;  %s2680_s25 = sphi %s2814_s25, %s3375_s25   ;;  %s2676_s24 = sphi %s2812_s24, %s3374_s24   ;;  %s2672_s23 = sphi %s2810_s23, %s3373_s23   ;;  %s2668_s22 = sphi %s2808_s22, %s3372_s22   ;;  %s2664_s21 = sphi %s2806_s21, %s3371_s21  }
  0x1d   : > { %3315 = sst [smem:[#allocation18_spill]] %s2668_s22  ;;  %s48_s18 = sadd.s32 1, %s2700_s30 }
  0x1e   : > { %3316 = sst [smem:[#allocation19_spill]] %s2672_s23  ;;  %p46_p0 = scmp.ge.s32.totalorder %s45_s17, 2 }
  0x1f   : > { %3317 = sst [smem:[#allocation20_spill]] %s2680_s25  ;;  %s310_s19 = sadd.s32 1, %s2684_s26 }
  0x20   : > { %3318 = sst [smem:[#allocation21_spill]] %s2684_s26  ;;  %p317_p1 = scmp.ne.s32.totalorder %s2684_s26, %s2680_s25 }
  0x21   : > { %3319 = sst [smem:[#allocation22_spill]] %s2692_s28  ;;  %p318_p2 = scmp.eq.s32.totalorder %s2704_s0, 0 }
  0x22   : > { %3320 = sst [smem:[#allocation23_spill]] %s2696_s29  ;;  %s3382_s17 = smov (%p46_p0, %s45_s17), 0 }
  0x23   : > { %3321 = sst [smem:[#allocation24_spill]] %s2700_s30  ;;  %s3384_s18 = smov (!%p46_p0, %s48_s18), %s2700_s30 }
  0x24   : > { %3322 = sst [smem:[#allocation25_spill]] %s2704_s0  ;;  %s307_s20 = ssub.s32 %s2696_s29, %s3382_s17 }
  0x25   : > { %3323 = sst [smem:[#allocation26_spill]] %s3382_s17  ;;  %p319_p3 = por %p318_p2, %p317_p1 }
  0x26   : > { %p50_p4 = scmp.ge.s32.totalorder %s3384_s18, 2  ;;  %p308_p5 = scmp.eq.s32.totalorder %s307_s20, 0 }
  0x27   : > { %p2306_p6 = scmp.lt.s32.totalorder %s2704_s0, 4  ;;  %s579_s14 = sand.u32 1, %s2704_s0  }
  0x28   : > { %s3386_s18 = smov (%p50_p4, %s3384_s18), 0  ;;  %s2882_s11 = sand.u32 1, %s2684_s26  }
  0x29   : > { %3324 = sst [smem:[#allocation27_spill]] %s3386_s18  ;;  %s463_s12 = ssub.s32 %s2700_s30, %s3386_s18 }
  0x2a   : > { %s2876_s16 = scalar_select %p308_p5, %s2684_s26, %s310_s19  }
  0x2b   : > { %s2272_s9 = smul.u32 144, %s2882_s11  ;;  %p2885_p7 = pnand %p2306_p6, %p319_p3 }
  0x2c   : > { %3325 = sst [smem:[#allocation28_spill]] %s2876_s16  ;;  %s2273_s20 = smul.u32 144, %s2696_s29 }
  0x2d   : > { %s3327_s10 = sld [smem:[#allocation43_spill]]  ;;  %s583_s18 = scalar_lea.vmem [#allocation7], %s2272_s9 }
  0x2e   : > { %s591_s30 = sshll.u32 %s583_s18, 4  ;;  %s2893_s26 = scalar_lea.sflag [#allocation8], %s579_s14  ;;  %s592_s30 = int_to_ptr.vmem [resolvable:$true] %s591_s30 }
  0x2f   : > { %s2706_s6 = smov 64   ;;  %s2707_s4 = smov 4  }
  0x30   : > { %s2899_s7 = sadd.s32 4294967295, %s2704_s0   ;;  %s2054_s8 = sadd.s32 4294967294, %s2704_s0  }
  0x31   : > { %p323_p8 = scmp.ne.s32.totalorder %s2680_s25, %s2676_s24  ;;  %p324_p9 = scmp.eq.s32.totalorder %s2899_s7, 0 }
  0x32   : > { %p464_p10 = scmp.eq.s32.totalorder %s463_s12, 0  ;;  %s466_s9 = sadd.s32 1, %s2672_s23 }
  0x33   : > { %s588_s19 = scalar_lea.hbm %s3327_s10, %s2273_s20  ;;  %p2908_p11 = por %p324_p9, %p323_p8 }
  0x34   : > { %s589_s16 = sshll.u32 %s588_s19, 4  ;;  %p476_p12 = scmp.ne.s32.totalorder %s2672_s23, %s2668_s22  ;;  %s590_s16 = int_to_ptr.hbm [resolvable:$true] %s589_s16 }
  0x35   : > { %2294 = dma.hbm_to_vmem [thread:$0]  (!%p2885_p7), %s590_s16, 2304, %s592_s30, %s2893_s26, %s2706_s6, %s2706_s6, %s2707_s4  }
  0x36   : > { %s2915_s18 = scalar_select %p464_p10, %s2672_s23, %s466_s9  }
  0x37   : > { %p477_p13 = scmp.eq.s32.totalorder %s2899_s7, 3  ;;  %p482_p0 = scmp.ne.s32.totalorder %s2668_s22, %s2664_s21 }
  0x38   : > { %3329 = sst [smem:[#allocation29_spill]] %s2915_s18  ;;  %p483_p1 = scmp.eq.s32.totalorder %s2054_s8, 3 }
  0x39   : > { %p2055_p2 = scmp.ge.s32.totalorder %s2704_s0, 1  ;;  %p2921_p3 = por %p477_p13, %p476_p12 }
  0x3a   : > { %p490_p4 = scmp.lt.s32.totalorder %s2704_s0, 5  ;;  %p2926_p5 = por %p483_p1, %p482_p0 }
  0x3b   : > { %s3330_s4 = scalar_select %p2921_p3, 1, 0 }
  0x3c   : > { %s3332_s6 = scalar_select %p2926_p5, 1, 0 }
  0x3d   : > { %3331 = sst [smem:[#allocation30_spill]] %s3330_s4  ;;  %p2930_p6 = pnand %p2055_p2, %p490_p4 }
  0x3e   : > { %3333 = sst [smem:[#allocation31_spill]] %s3332_s6  ;;  %s2708_s20 = smov [#allocation4]  }
  0x3f   : > { %s3335_s1 = sld [smem:[#allocation36_spill]]  ;;  %p2287_p8 = pneg %p2930_p6 }
  0x40   : > { %s503_s19 = sshll.u32 %s2708_s20, 4  ;;  %s3336_s13 = sld [smem:[#allocation46_spill]]  ;;  %s504_s19 = int_to_ptr.vmem [resolvable:$true] %s503_s19 }
  0x41   : > { %p2288_p10 = pnand %p2287_p8, %p324_p9  ;;  %s2709_s24 = smov 128  }
  0x42   : > { %s618_s18 = scalar_lea.vmem [#allocation9], %s2882_s11  ;;  %s3337_s15 = sld [smem:[#allocation48_spill]] }
  0x43   : > { %s625_s23 = sshll.u32 %s618_s18, 4  ;;  %s641_s4 = scalar_lea.vmem [#allocation10], %s2882_s11  ;;  %s626_s23 = int_to_ptr.vmem [resolvable:$true] %s625_s23 }
  0x44   : > { %s648_s8 = sshll.u32 %s641_s4, 4  ;;  %s649_s8 = int_to_ptr.vmem [resolvable:$true] %s648_s8 }
  0x45   : > { %s501_s30 = sshll.u32 %s3335_s1, 4  ;;  %s2710_s1 = smov 8   ;;  %s502_s30 = int_to_ptr.hbm [resolvable:$true] %s501_s30 }
  0x46   : > { %s621_s10 = scalar_lea.hbm %s3336_s13, %s2696_s29 }
  0x47   : > { %s623_s16 = sshll.u32 %s621_s10, 4  ;;  %s639_s10 = scalar_lea.sflag [#allocation11], %s2882_s11  ;;  %s624_s16 = int_to_ptr.hbm [resolvable:$true] %s623_s16 }
  0x48   : > { %2290 = dma.hbm_to_vmem [thread:$0]  (!%p2288_p10), %s502_s30, 256, %s504_s19, [#allocation5], %s2709_s24, %s2709_s24, %s2710_s1  }
  0x49   : > { %2297 = dma.hbm_to_vmem [thread:$0]  (!%p2885_p7), %s624_s16, 16, %s626_s23, %s2893_s26  }
  0x4a   : > { %s644_s21 = scalar_lea.hbm %s3337_s15, %s2696_s29  ;;  %657 = sbr.rel (%p2930_p6) target bundleno = 2173 (0x87d), region = 84 }
  0x4b   : > { %s646_s0 = sshll.u32 %s644_s21, 4  ;;  %s647_s0 = int_to_ptr.hbm [resolvable:$true] %s646_s0 }
  0x4c   : > { %2300 = dma.hbm_to_vmem [thread:$0]  (!%p2885_p7), %s647_s0, 16, %s649_s8, %s639_s10  }
  0x4f   : > { %2647 = dma.done.wait (%p324_p9), [#allocation5], 256  }
  0x50   : > { %2649 = vsyncadd (%p324_p9), [#allocation5], 4294967040  ;;  %s664_s1 = sand.u32 1, %s2899_s7   ;;  %s2965_s21 = sand.u32 1, %s2680_s25  }
  0x51   : > { %3338 = sst [smem:[#allocation32_spill]] %s2965_s21  ;;  %s2274_s23 = smul.u32 144, %s2965_s21 }
  0x52   : > { %s665_s11 = scalar_lea.sflag [#allocation8], %s664_s1 }
  0x53   : > { %s2968_s26 = scalar_lea.vmem [#allocation7], %s2274_s23 }
  0x54   : > { %3339 = sst [smem:[#allocation33_spill]] %s2968_s26 }
  0x55   : > { %2651 = dma.done.wait (%p2908_p11), %s665_s11, 2320  }
  0x56   : > { %2653 = vsyncadd (%p2908_p11), %s665_s11, 4294964976  ;;  %s684_s17 = scalar_lea.sflag [#allocation11], %s2965_s21 }
  0x57   : > { %2655 = dma.done.wait (%p2908_p11), %s684_s17, 16  }
  0x58   : > { %2657 = vsyncadd (%p2908_p11), %s684_s17, 4294967280  ;;  %s3290_s7 = sand.u32 1, %s2668_s22   ;;  %p790_p7 = scmp.lt.s32.totalorder %s2692_s28, 1 }
  0x59   : > { %s2061_s4 = sshll.u32 %s3290_s7, 4  ;;  %p803_p9 = scmp.lt.s32.totalorder %s2688_s27, 1 }
  0x5a   : > { %s2987_s6 = scalar_select %p790_p7, %s2692_s28, 1 }
  0x5b   : > { %s2990_s12 = scalar_select %p803_p9, %s2688_s27, 1 }
  0x5c   : > { %s2235_s14 = sshll.u32 %s2987_s6, 4  ;;  %s3340_s20 = sld [smem:[#allocation35_spill]] }
  0x5d   : > { %s3341_s3 = sld [smem:[#allocation37_spill]]  ;;  %s2237_s11 = sshll.u32 %s2990_s12, 4 }
  0x5e   : > { %s3343_s15 = sld [smem:[#allocation38_spill]]  ;;  %s2239_s26 = sshll.u32 %s2990_s12, 5 }
  0x5f   : > { %s3344_s9 = sld [smem:[#allocation39_spill]]  ;;  %p2072_p11 = scmp.ne.s32.totalorder %s2688_s27, 0 }
  0x60   : > { %s3347_s17 = sld [smem:[#allocation42_spill]] }
  0x61   : > { %s3350_s24 = sld [smem:[#allocation45_spill]] }
  0x62   : > { %s794_s8 = scalar_lea.vmem %s3340_s20, %s2235_s14  ;;  %s3345_s20 = sld [smem:[#allocation40_spill]] }
  0x63   : > { %s3003_s23 = scalar_lea.vmem %s3341_s3, %s2235_s14  ;;  %s3346_s3 = sld [smem:[#allocation41_spill]] }
  0x64   : > { %3342 = sst [smem:[#allocation34_spill]] %s3003_s23  ;;  %s807_s29 = scalar_lea.vmem %s3343_s15, %s2237_s11 }
  0x65   : > { %s3016_s25 = scalar_lea.vmem %s3344_s9, %s2237_s11  ;;  %s3348_s15 = sld [smem:[#allocation44_spill]] }
  0x66   : > { %s824_s18 = scalar_lea.vmem %s3347_s17, %s2990_s12  ;;  %s3349_s11 = sld [smem:[#allocation47_spill]] }
  0x67   : > { %s3044_s14 = scalar_lea.vmem [#allocation12], %s2061_s4 }
  0x68   : > { %s818_s10 = scalar_lea.vmem %s3345_s20, %s2990_s12  ;;  %s3042_s20 = scalar_lea.vmem %s3350_s24, %s2239_s26 }
  0x69   : > { %s821_s22 = scalar_lea.vmem %s3346_s3, %s2990_s12  ;;  %840 = sbr.rel (%p2072_p11) target bundleno = 116 (0x74), region = 104 }
  0x6b   : > { %s827_s0 = scalar_lea.vmem %s3348_s15, %s2990_s12 }
  0x6c   : > { %s835_s19 = scalar_lea.vmem %s3349_s11, %s2990_s12 }
  0x6e   : > { %v841_v0 = vld [vmem:[%s794_s8] sm:$0xff]  ;;  %vm847_vm0 = vcmask 261120   ;;  %v842_v2 = vld [vmem:[%s794_s8 + $0x8] sm:$0xff] }
  0x6f   : > { %v843_v1 = vld [vmem:[#allocation4] sm:$0xff]  ;;  %v844_v4 = vld [vmem:[#allocation4 + $0x8] sm:$0xff] }
  0x70   : > { %v845_v3 = vadd.f32 %v843_v1, %v841_v0  ;;  %v846_v5 = vadd.f32 %v844_v4, %v842_v2 }
  0x72   : > { %848 = vst.msk [vmem:[#allocation2] sm:$0xff] %vm847_vm0, %v845_v3 }
  0x73   : > { %849 = vst.msk [vmem:[#allocation2 + $0x8] sm:$0xff] %vm847_vm0, %v846_v5 }
  0x74 PF: > { %v2241_v6 = vld [vmem:[%s807_s29 + $0x8] sm:$0xff]  ;;  %v2240_v7 = vld [vmem:[%s807_s29] sm:$0xff]  ;;  %vm886_vm1 = vcmask 261120   ;;  %s3351_s21 = scalar_lea.vmem %s3266_s5, %s2990_s12  ;;  %s2711_s29 = smov 96   ;;  %vm925_vm2 = vcmask 130048   ;;  %vm1186_vm3 = vcmask 254976  }
  0x75   : > { %896 = vmatpush.bf16.msra.mxu0 %v2241_v6  ;;  %v2419_v11 = vld [vmem:[%s3351_s21] ss:$0 sm:$0xff]  ;;  %s2712_s26 = smov 112   ;;  %s2713_s4 = smov 80   ;;  %vm1188_vm5 = vcmask 257026   ;;  %vm1192_vm12 = vcmask 1041408  }
  0x76   : > { %s3352_s1 = scalar_lea.vmem %s3263_s2, %s2987_s6  ;;  %s2714_s6 = smov 48   ;;  %vm1193_vm13 = vcmask 1045508   ;;  %vm1204_vm15 = vcmask 257024   ;;  %vm1322_vm0 = vcmask 1046528  }
  0x77   : > { %v2420_v33 = vld [vmem:[%s3352_s1] ss:$0 sm:$0xff]  ;;  %s2715_s7 = smov 64   ;;  %s2716_s17 = smov 16   ;;  %vm1194_vm14 = vmor %vm1192_vm12, %vm1193_vm13 }
  0x78   : > { %s3354_s30 = sld [smem:[#allocation34_spill]]  ;;  %p2229_p12 = scmp.ne.s32.totalorder %s2688_s27, 1 }
  0x79   : > { %v3047_v8 = vld [vmem:[#allocation2] sm:$0xff]  ;;  %897 = vmatpush.bf16.msra.mxu0 %v2240_v7 }
  0x7a   : > { %v3049_v9 = vld [vmem:[#allocation2 + $0x8] sm:$0xff] }
  0x7b   : > { %v865_v10 = vpack.c.bf16 %v3049_v9, %v3047_v8 }
  0x7d   : > { %2081 = vmatmul.msk.bf16.vlgmr.msra.gmra.mxu0 %vm886_vm1, %v865_v10 }
  0xfa   : > { %v899_v12 = vpop.f32.mrf.mxu0 }
  0xfb   : > { %v900_v13 = vadd.f32 %v2419_v11, %v899_v12 }
  0xfd   : > { %v904_v14 = vmul.f32 0.25, %v900_v13  ;;  %v908_v16 = vpack.c.bf16 %v900_v13, %v900_v13 }
  0xff   : > { %v906_v18 = vpack.c.bf16 %v904_v14, %v904_v14  ;;  %v920_v21 = vunpack.c.l.b16 %v908_v16 }
 0x101   : > { %v915_v25 = vunpack.c.l.b16 %v906_v18 }
 0x102   : > { %v901_v15 = vpop.f32.mrf.mxu0 }
 0x103   : > { %v902_v17 = vadd.f32 %v2419_v11, %v901_v15 }
 0x105   : > { %v905_v19 = vmul.f32 0.25, %v902_v17  ;;  %v909_v20 = vpack.c.bf16 %v902_v17, %v902_v17 }
 0x107   : > { %v907_v22 = vpack.c.bf16 %v905_v19, %v905_v19  ;;  %v921_v23 = vunpack.c.l.b16 %v909_v20 }
 0x109   : > { %v922_v24 = vpack.c.b16 %v921_v23, %v920_v21  ;;  %v916_v26 = vunpack.c.l.b16 %v907_v22 }
 0x10b   : > { %923 = vrot.lane.b32.xlu0 %v922_v24, %s2711_s29  ;;  %v917_v27 = vpack.c.b16 %v916_v26, %v915_v25 }
 0x10d   : > { %995 = vrot.lane.b32.xlu1 %v917_v27, %s2712_s26 }
 0x113   : > { %997 = vrot.lane.b32.xlu0 %v922_v24, %s2713_s4 }
 0x17d   : > { %v924_v28 = vpop.permute.xlu0 %923 }
 0x17e   : > { %v930_v29 = vsel %vm925_vm2, %v924_v28, 0  ;;  %v2243_v28 = vld [vmem:[%s3016_s25 + $0x8] sm:$0xff] }
 0x17f   : > { %939 = vmatpush.bf16.xpose.msra.mxu1 %v930_v29  ;;  %v996_v32 = vpop.permute.xlu1 %995  ;;  %1108 = vmatpush.bf16.msrb.mxu0 %v2243_v28  ;;  %v2242_v29 = vld [vmem:[%s3016_s25] sm:$0xff] }
 0x183   : > { %1109 = vmatpush.bf16.msrb.mxu0 %v2242_v29 }
 0x185   : > { %v998_v30 = vpop.permute.xlu0 %997 }
 0x186   : > { %2082 = vmatmul.msk.bf16.vlgmr.msra.gmra.mxu1 %vm925_vm2, %v917_v27  ;;  %v1003_v31 = vsel %vm925_vm2, %v998_v30, 0 }
 0x187   : > { %1012 = vmatpush.bf16.xpose.msra.mxu3 %v1003_v31 }
 0x18e   : > { %2084 = vmatmul.msk.bf16.vlgmr.msra.gmra.mxu3 %vm925_vm2, %v996_v32 }
 0x203   : > { %v941_v34 = vpop.f32.mrf.mxu1 }
 0x204   : > { %v942_v35 = vadd.f32 %v2420_v33, %v941_v34 }
 0x206   : > { %v946_v36 = vsel %vm925_vm2, %v942_v35, -inf }
 0x207   : > { %947 = vmax.xlane.f32.xlu1 %v946_v36 }
 0x20b   : > { %v943_v40 = vpop.f32.mrf.mxu1 }
 0x20c   : > { %v944_v41 = vadd.f32 %v2420_v33, %v943_v40 }
 0x20e   : > { %v949_v45 = vsel %vm925_vm2, %v944_v41, -inf }
 0x211   : > { %v1014_v37 = vpop.f32.mrf.mxu3 }
 0x212   : > { %v1015_v38 = vadd.f32 %v2420_v33, %v1014_v37 }
 0x214   : > { %v1019_v39 = vsel %vm925_vm2, %v1015_v38, -inf }
 0x215   : > { %1020 = vmax.xlane.f32.xlu2 %v1019_v39 }
 0x219   : > { %v1016_v42 = vpop.f32.mrf.mxu3 }
 0x21a   : > { %v1017_v43 = vadd.f32 %v2420_v33, %v1016_v42 }
 0x21c   : > { %v1022_v44 = vsel %vm925_vm2, %v1017_v43, -inf }
 0x21d   : > { %1023 = vmax.xlane.f32.xlu0 %v1022_v44  ;;  %950 = vmax.xlane.f32.xlu2 %v949_v45 }
 0x231   : > { %1048 = vrot.lane.b32.xlu0 %v922_v24, %s2714_s6 }
 0x27a   : > { %v948_v46 = vpop.xlane.xlu1 %947 }
 0x27b   : > { %v952_v47 = vsub.f32 %v942_v35, %v948_v46 }
 0x27d   : > { %v954_v48 = vmul.f32 1.442695, %v952_v47 }
 0x27f   : > { %2428 = vpow2.f32 %v954_v48 }
 0x285   : > { %v2429_v49 = vpop.eup %2428 }
 0x286   : > { %v958_v50 = vsel %vm925_vm2, %v2429_v49, 0.0 }
 0x287   : > { %959 = vadd.xlane.f32.xlu2 %v958_v50  ;;  %v2717_v50 = vmov 32.0  }
 0x288   : > { %v1021_v51 = vpop.xlane.xlu2 %1020 }
 0x289   : > { %v1025_v52 = vsub.f32 %v1015_v38, %v1021_v51 }
 0x28b   : > { %v1027_v53 = vmul.f32 1.442695, %v1025_v52 }
 0x28d   : > { %2430 = vpow2.f32 %v1027_v53  ;;  %v851_v53 = vld [vmem:[%s3354_s30] sm:$0xff] }
 0x290   : > { %v951_v54 = vpop.xlane.xlu2 %950  ;;  %v1024_v61 = vpop.xlane.xlu0 %1023 }
 0x291   : > { %v953_v55 = vsub.f32 %v944_v41, %v951_v54  ;;  %v1026_v62 = vsub.f32 %v1017_v43, %v1024_v61  ;;  %v2421_v41 = vld [vmem:[%s818_s10] ss:$0 sm:$0xff]  ;;  %v2718_v54 = vmov 0   ;;  %s3355_s10 = sld [smem:[#allocation33_spill]] }
 0x292   : > { %2418 = vset.pattern.permute.xlu0 %v2718_v54  ;;  %1187 = vst.msk [vmem:[#allocation3] sm:$0x3] %vm1186_vm3, %v2718_v54  ;;  %2417 = vset.pattern.permute.xlu2 %v2718_v54 }
 0x293   : > { %v2431_v56 = vpop.eup %2430  ;;  %v956_v57 = vmul.f32 1.442695, %v953_v55  ;;  %v1029_v63 = vmul.f32 1.442695, %v1026_v62  ;;  %1189 = vst.msk [vmem:[#allocation3 + $0x8] sm:$0xc] %vm1188_vm5, %v2718_v54 }
 0x294   : > { %v1031_v58 = vsel %vm925_vm2, %v2431_v56, 0.0 }
 0x295   : > { %1032 = vadd.xlane.f32.xlu1 %v1031_v58  ;;  %2432 = vpow2.f32 %v956_v57 }
 0x296   : > { %2434 = vpow2.f32 %v1029_v63 }
 0x297   : > { %v2252_v29 = vld [vmem:[%s3355_s10 + $0x38] sm:$0xff] }
 0x298   : > { %1405 = vmatpush.bf16.msra.mxu0 %v2252_v29  ;;  %v2260_v54 = vld [vmem:[%s3355_s10 + $0x78] sm:$0xff] }
 0x29b   : > { %v2433_v59 = vpop.eup %2432 }
 0x29c   : > { %v961_v60 = vsel %vm925_vm2, %v2433_v59, 0.0  ;;  %v2435_v0 = vpop.eup %2434 }
 0x29d   : > { %962 = vadd.xlane.f32.xlu2 %v961_v60  ;;  %v1034_v1 = vsel %vm925_vm2, %v2435_v0, 0.0 }
 0x2a3   : > { %v1049_v12 = vpop.permute.xlu0 %1048 }
 0x2b5   : > { %975 = vrot.lane.b32.xlu2 %v922_v24, %s2715_s7 }
 0x2de   : > { %1035 = vadd.xlane.f32.xlu2 %v1034_v1 }
 0x2fa   : > { %v960_v2 = vpop.xlane.xlu2 %959 }
 0x2fb   : > { %2436 = vrcp.f32 %v960_v2 }
 0x301   : > { %v2437_v4 = vpop.eup %2436 }
 0x302   : > { %v966_v5 = vmul.f32 %v2437_v4, %v2429_v49 }
 0x304   : > { %v968_v11 = vpack.c.bf16 %v966_v5, %v966_v5 }
 0x306   : > { %v972_v14 = vunpack.c.l.b16 %v968_v11 }
 0x308   : > { %v1033_v17 = vpop.xlane.xlu1 %1032 }
 0x310   : > { %v963_v3 = vpop.xlane.xlu2 %962 }
 0x311   : > { %2438 = vrcp.f32 %v963_v3  ;;  %v852_v3 = vld [vmem:[%s3354_s30 + $0x8] sm:$0xff] }
 0x312   : > { %2440 = vrcp.f32 %v1033_v17 }
 0x317   : > { %v2439_v6 = vpop.eup %2438 }
 0x318   : > { %v976_v7 = vpop.permute.xlu2 %975  ;;  %v967_v10 = vmul.f32 %v2439_v6, %v2433_v59  ;;  %v2441_v19 = vpop.eup %2440 }
 0x319   : > { %988 = vmatpush.bf16.msra.mxu2 %v976_v7  ;;  %v1039_v20 = vmul.f32 %v2441_v19, %v2431_v56 }
 0x31a   : > { %v969_v13 = vpack.c.bf16 %v967_v10, %v967_v10 }
 0x31b   : > { %v1041_v22 = vpack.c.bf16 %v1039_v20, %v1039_v20 }
 0x31c   : > { %v973_v15 = vunpack.c.l.b16 %v969_v13 }
 0x31d   : > { %1061 = vmatpush.bf16.msrb.mxu2 %v1049_v12  ;;  %v1045_v25 = vunpack.c.l.b16 %v1041_v22 }
 0x31e   : > { %v974_v16 = vpack.c.b16 %v973_v15, %v972_v14  ;;  %v2246_v14 = vld [vmem:[%s3355_s10 + $0x8] sm:$0xff]  ;;  %v2248_v15 = vld [vmem:[%s3355_s10 + $0x18] sm:$0xff] }
 0x31f   : > { %1243 = vmatpush.bf16.msrb.mxu1 %v2246_v14  ;;  %1303 = vmatpush.bf16.msrb.mxu3 %v2248_v15 }
 0x320   : > { %2083 = vmatmul.msk.bf16.vlgmr.msra.gmra.mxu2 %vm925_vm2, %v974_v16  ;;  %v2250_v16 = vld [vmem:[%s3355_s10 + $0x28] sm:$0xff] }
 0x321   : > { %1347 = vmatpush.bf16.msra.mxu2 %v2250_v16 }
 0x351   : > { %v1036_v18 = vpop.xlane.xlu2 %1035 }
 0x352   : > { %2442 = vrcp.f32 %v1036_v18  ;;  %v2245_v18 = vld [vmem:[%s3355_s10] sm:$0xff] }
 0x353   : > { %2444 = vrcp.f32 %v2717_v50  ;;  %1244 = vmatpush.bf16.msrb.mxu1 %v2245_v18 }
 0x358   : > { %v2443_v21 = vpop.eup %2442 }
 0x359   : > { %v1040_v23 = vmul.f32 %v2443_v21, %v2435_v0  ;;  %v2445_v51 = vpop.eup %2444 }
 0x35a   : > { %v1127_v52 = vmul.f32 32.0, %v2445_v51  ;;  %vm1131_vm4 = vweird.f32 %v2445_v51 }
 0x35b   : > { %v1042_v24 = vpack.c.bf16 %v1040_v23, %v1040_v23 }
 0x35d   : > { %v1046_v26 = vunpack.c.l.b16 %v1042_v24  ;;  %v2422_v24 = vld [vmem:[%s821_s22] ss:$0 sm:$0xff] }
 0x35f   : > { %v1047_v27 = vpack.c.b16 %v1046_v26, %v1045_v25  ;;  %v2247_v25 = vld [vmem:[%s3355_s10 + $0x10] sm:$0xff]  ;;  %v2249_v26 = vld [vmem:[%s3355_s10 + $0x20] sm:$0xff] }
 0x360   : > { %1304 = vmatpush.bf16.msrb.mxu3 %v2247_v25  ;;  %1348 = vmatpush.bf16.msra.mxu2 %v2249_v26 }
 0x361   : > { %2085 = vmatmul.msk.bf16.vlgmr.msrb.gmra.mxu2 %vm925_vm2, %v1047_v27 }
 0x3a3   : > { %v990_v30 = vpop.f32.mrf.mxu2 }
 0x3ab   : > { %v992_v31 = vpop.f32.mrf.mxu2 }
 0x3e4   : > { %v1063_v32 = vpop.f32.mrf.mxu2 }
 0x3ec   : > { %v1065_v33 = vpop.f32.mrf.mxu2 }
 0x3ed   : > { %v2412_v34 = vpack.i.bf16 %v1065_v33, %v1063_v32 }
 0x3ef   : > { %2413 = vrot.lane.b32.xlu1 %v2412_v34, %s2716_s17 }
 0x461   : > { %v2414_v35 = vpop.permute.xlu1 %2413 }
 0x462   : > { %v2416_v36 = vunpack.i.h.bf16 %v2414_v35  ;;  %v2415_v37 = vunpack.i.l.bf16 %v2414_v35 }
 0x464   : > { %v1077_v38 = vsel %vm925_vm2, %v992_v31, %v2416_v36  ;;  %v1076_v39 = vsel %vm925_vm2, %v990_v30, %v2415_v37  ;;  %v2254_v30 = vld [vmem:[%s3355_s10 + $0x48] sm:$0xff]  ;;  %v2423_v31 = vld [vmem:[%s824_s18] ss:$0 sm:$0xff]  ;;  %vm1269_vm2 = vsmask.f32 7424 }
 0x465   : > { %v1082_v40 = vpack.c.bf16 %v1077_v38, %v1076_v39  ;;  %1449 = vmatpush.bf16.msra.mxu1 %v2254_v30  ;;  %v2251_v38 = vld [vmem:[%s3355_s10 + $0x30] sm:$0xff] }
 0x466   : > { %1406 = vmatpush.bf16.msra.mxu0 %v2251_v38 }
 0x467   : > { %2094 = vmatmul.msk.bf16.vlgmr.msrb.gmra.mxu0 %vm886_vm1, %v1082_v40 }
 0x46a   : > { %1609 = vmatpush.bf16.msrb.mxu0 %v2260_v54 }
 0x4e4   : > { %v1111_v42 = vpop.f32.mrf.mxu0 }
 0x4e5   : > { %v1112_v43 = vadd.f32 %v2421_v41, %v1111_v42  ;;  %v2256_v42 = vld [vmem:[%s3355_s10 + $0x58] sm:$0xff] }
 0x4e6   : > { %1507 = vmatpush.bf16.msra.mxu3 %v2256_v42 }
 0x4e7   : > { %v1116_v44 = vadd.f32 %v1112_v43, %v3047_v8  ;;  %v1128_v8 = vsub.f32 1.0, %v1127_v52  ;;  %v2255_v52 = vld [vmem:[%s3355_s10 + $0x50] sm:$0xff] }
 0x4e9   : > { %v1120_v45 = vsel %vm886_vm1, %v1116_v44, 0.0  ;;  %v1129_v55 = vmul.f32 %v2445_v51, %v1128_v8 }
 0x4ea   : > { %1121 = vadd.xlane.f32.xlu1 %v1120_v45  ;;  %v2258_v45 = vld [vmem:[%s3355_s10 + $0x68] sm:$0xff]  ;;  %1508 = vmatpush.bf16.msra.mxu3 %v2255_v52 }
 0x4eb   : > { %v1130_v56 = vadd.f32 %v2445_v51, %v1129_v55  ;;  %1551 = vmatpush.bf16.msrb.mxu2 %v2258_v45 }
 0x4ec   : > { %v1113_v46 = vpop.f32.mrf.mxu0 }
 0x4ed   : > { %v1114_v47 = vadd.f32 %v2421_v41, %v1113_v46  ;;  %v2253_v46 = vld [vmem:[%s3355_s10 + $0x40] sm:$0xff] }
 0x4ee   : > { %1450 = vmatpush.bf16.msra.mxu1 %v2253_v46 }
 0x4ef   : > { %v1117_v48 = vadd.f32 %v1114_v47, %v3049_v9  ;;  %v3094_v9 = vsel %vm1131_vm4, %v2445_v51, %v1130_v56  ;;  %vm1424_vm4 = vcmask 1045504  }
 0x4f1   : > { %v1123_v49 = vsel %vm886_vm1, %v1117_v48, 0.0 }
 0x4f2   : > { %1124 = vadd.xlane.f32.xlu0 %v1123_v49 }
 0x506   : > { %855 = vperm.xlu0 %2418, %v851_v53   ;;  %v2257_v53 = vld [vmem:[%s3355_s10 + $0x60] sm:$0xff] }
 0x507   : > { %1552 = vmatpush.bf16.msrb.mxu2 %v2257_v53 }
 0x55d   : > { %v1122_v57 = vpop.xlane.xlu1 %1121 }
 0x55e   : > { %v1133_v58 = vmul.f32 %v3094_v9, %v1122_v57 }
 0x560   : > { %v1135_v59 = vsub.f32 %v1116_v44, %v1133_v58 }
 0x562   : > { %v1137_v60 = vmul.f32 %v1135_v59, %v1135_v59 }
 0x564   : > { %v1139_v61 = vsel %vm886_vm1, %v1137_v60, 0.0 }
 0x565   : > { %v1125_v62 = vpop.xlane.xlu0 %1124  ;;  %1140 = vadd.xlane.f32.xlu2 %v1139_v61  ;;  %v2262_v61 = vld [vmem:[%s3355_s10 + $0x88] sm:$0xff] }
 0x566   : > { %v1134_v63 = vmul.f32 %v3094_v9, %v1125_v62 }
 0x568   : > { %v3099_v0 = vsub.f32 %v1117_v48, %v1134_v63 }
 0x56a   : > { %v1138_v1 = vmul.f32 %v3099_v0, %v3099_v0 }
 0x56c   : > { %v1142_v2 = vsel %vm886_vm1, %v1138_v1, 0.0 }
 0x56d   : > { %1143 = vadd.xlane.f32.xlu2 %v1142_v2 }
 0x578   : > { %v3126_v36 = vpop.permute.xlu0 %855 }
 0x585   : > { %860 = vperm.xlu2 %2417, %v852_v3  }
 0x5d8   : > { %v1141_v4 = vpop.xlane.xlu2 %1140 }
 0x5d9   : > { %v1145_v5 = vmul.f32 %v1141_v4, %v3094_v9 }
 0x5db   : > { %v1147_v6 = vadd.f32 1e-05, %v1145_v5 }
 0x5dd   : > { %2446 = vrsqrt.f32 %v1147_v6  ;;  %vm1155_vm7 = vweird.f32 %v1147_v6 }
 0x5e0   : > { %v1144_v7 = vpop.xlane.xlu2 %1143 }
 0x5e1   : > { %v1146_v10 = vmul.f32 %v1144_v7, %v3094_v9 }
 0x5e3   : > { %v2447_v11 = vpop.eup %2446  ;;  %v1148_v12 = vadd.f32 1e-05, %v1146_v10 }
 0x5e4   : > { %v1150_v13 = vmul.f32 %v2447_v11, %v1147_v6  ;;  %vm1156_vm6 = vweird.f32 %v2447_v11 }
 0x5e5   : > { %2448 = vrsqrt.f32 %v1148_v12  ;;  %vm1157_vm8 = vmor %vm1155_vm7, %vm1156_vm6  ;;  %vm1165_vm10 = vweird.f32 %v1148_v12  ;;  %vm1468_vm6 = vsmask.f32 5376  ;;  %vm1570_vm7 = vsmask.f32 4352 }
 0x5e6   : > { %v1151_v17 = vmul.f32 %v2447_v11, %v1150_v13  ;;  %v2261_v13 = vld [vmem:[%s3355_s10 + $0x80] sm:$0xff] }
 0x5e8   : > { %v1152_v19 = vmul.f32 0.5, %v1151_v17  ;;  %v3138_v49 = vpop.permute.xlu2 %860 }
 0x5ea   : > { %v1153_v20 = vsub.f32 1.5, %v1152_v19 }
 0x5eb   : > { %v2449_v21 = vpop.eup %2448 }
 0x5ec   : > { %v1154_v22 = vmul.f32 %v2447_v11, %v1153_v20  ;;  %v1160_v23 = vmul.f32 %v2449_v21, %v1148_v12  ;;  %vm1166_vm9 = vweird.f32 %v2449_v21 }
 0x5ed   : > { %vm1167_vm11 = vmor %vm1165_vm10, %vm1166_vm9 }
 0x5ee   : > { %v1161_v27 = vmul.f32 %v2449_v21, %v1160_v23  ;;  %v1158_v28 = vsel %vm1157_vm8, %v2447_v11, %v1154_v22  ;;  %vm1695_vm8 = vcmask 523264  }
 0x5ef   : > { %v1169_v32 = vmul.f32 %v1158_v28, %v1135_v59  ;;  %v2259_v59 = vld [vmem:[%s3355_s10 + $0x70] sm:$0xff] }
 0x5f0   : > { %v1162_v33 = vmul.f32 0.5, %v1161_v27  ;;  %1610 = vmatpush.bf16.msrb.mxu0 %v2259_v59 }
 0x5f1   : > { %v1174_v34 = vmul.f32 %v2422_v24, %v1169_v32 }
 0x5f2   : > { %v1163_v35 = vsub.f32 1.5, %v1162_v33 }
 0x5f3   : > { %v1179_v37 = vadd.f32 %v2423_v31, %v1174_v34 }
 0x5f4   : > { %v1164_v39 = vmul.f32 %v2449_v21, %v1163_v35 }
 0x5f5   : > { %v3130_v40 = vmul.f32 %v1179_v37, %v3126_v36 }
 0x5f6   : > { %v1168_v41 = vsel %vm1167_vm11, %v2449_v21, %v1164_v39 }
 0x5f7   : > { %v1184_v43 = vpack.c.bf16 %v3130_v40, %v3130_v40  ;;  %v1170_v44 = vmul.f32 %v1168_v41, %v3099_v0 }
 0x5f9   : > { %v1195_v47 = vrot.slane %v1184_v43, 6  ;;  %v1175_v48 = vmul.f32 %v2422_v24, %v1170_v44 }
 0x5fb   : > { %1203 = vst.msk [vmem:[#allocation3] sm:$0xc] %vm1188_vm5, %v1195_v47  ;;  %v1180_v50 = vadd.f32 %v2423_v31, %v1175_v48  ;;  %v1196_v55 = vrot.slane %v1195_v47, 4  ;;  %vm1526_vm5 = vcmask 1044480  }
 0x5fd   : > { %v3142_v51 = vmul.f32 %v1180_v50, %v3138_v49 }
 0x5ff   : > { %v1185_v8 = vpack.c.bf16 %v3142_v51, %v3142_v51 }
 0x601   : > { %v1197_v56 = vrot.slane %v1185_v8, 6 }
 0x602   : > { %v1313_v60 = vld [vmem:[#allocation3] sm:$0xe] }
 0x603   : > { %v1198_v57 = vsel %vm1194_vm14, %v1196_v55, %v1197_v56  ;;  %v1199_v58 = vrot.slane %v1197_v56, 4  ;;  %v1415_v0 = vld [vmem:[#allocation3] sm:$0xc]  ;;  %v1320_v3 = vunpack.c.l.b16 %v1313_v60 }
 0x604   : > { %1205 = vst.msk [vmem:[#allocation3 + $0x4] sm:$0xf] %vm1204_vm15, %v1198_v57  ;;  %v1422_v17 = vunpack.c.l.b16 %v1415_v0  ;;  %v1517_v30 = vld [vmem:[#allocation3] sm:$0x8] }
 0x605   : > { %1206 = vst.msk [vmem:[#allocation3 + $0x8] sm:$0x3] %vm1186_vm3, %v1199_v58  ;;  %vm1366_vm3 = vsmask.f32 6400  ;;  %v1524_v43 = vunpack.c.l.b16 %v1517_v30 }
 0x60b   : > { %v2244_v62 = vld [vmem:[#allocation3] sm:$0xff] }
 0x60c   : > { %v2269_v63 = vld [vmem:[#allocation3] sm:$0xff]   ;;  %v1255_v2 = vld [vmem:[#allocation3 + $0x8] sm:$0x1]  ;;  %2107 = vmatmul.msk.bf16.vlgmr.msrb.gmra.mxu1 %vm886_vm1, %v2244_v62 }
 0x60d   : > { %v3152_v1 = vunpack.c.h.b16 %v2269_v63  ;;  %v1273_v4 = vshll.u32 %v2269_v63, 16  ;;  %v1357_v5 = vld [vmem:[#allocation3 + $0x8] sm:$0x3]  ;;  %v1266_v6 = vunpack.c.l.b16 %v1255_v2  ;;  %1646 = vmatpush.bf16.msrb.mxu1 %v2262_v61  ;;  %v1271_v15 = vshrl.u32 %v2269_v63, 16 }
 0x60e   : > { %v1364_v7 = vunpack.c.l.b16 %v1357_v5  ;;  %v1459_v10 = vld [vmem:[#allocation3 + $0x8] sm:$0x7] }
 0x60f   : > { %v1321_v11 = vpack.c.b16 %v3152_v1, %v1320_v3  ;;  %v1275_v12 = vrot.slane %v1273_v4, 1  ;;  %v1268_v14 = vpack.c.b16 %v1266_v6, %v1266_v6  ;;  %v1561_v18 = vld [vmem:[#allocation3 + $0x8] sm:$0xf]  ;;  %v1466_v22 = vunpack.c.l.b16 %v1459_v10 }
 0x610   : > { %v1365_v16 = vpack.c.b16 %v1364_v7, %v1364_v7  ;;  %v1568_v31 = vunpack.c.l.b16 %v1561_v18  ;;  %v1423_v38 = vpack.c.b16 %v3152_v1, %v1422_v17  ;;  %v1525_v45 = vpack.c.b16 %v3152_v1, %v1524_v43  ;;  %v2266_v18 = vld [vmem:[%s3042_s20 + $0x18] sm:$0xff] }
 0x611   : > { %v1323_v19 = vrot.slane %v1321_v11, 1  ;;  %v1368_v20 = vshrl.u32 %v1321_v11, 16  ;;  %v1371_v21 = vshll.u32 %v1321_v11, 16  ;;  %v1324_v23 = vrot.slane %v1268_v14, 1  ;;  %1647 = vmatpush.bf16.msrb.mxu1 %v2261_v13 }
 0x612   : > { %v1278_v24 = vshll.u32 %v1268_v14, 16  ;;  %v1376_v25 = vshrl.u32 %v1365_v16, 16  ;;  %v1379_v26 = vshll.u32 %v1365_v16, 16  ;;  %v1276_v27 = vor.u32 %v1275_v12, %v1271_v15 }
 0x613   : > { %v1370_v28 = vrot.slane %v1368_v20, 1  ;;  %v1373_v29 = vrot.slane %v1371_v21, 2  ;;  %v1325_v32 = vsel %vm1322_vm0, %v1323_v19, %v1324_v23  ;;  %v1467_v42 = vpack.c.b16 %v1466_v22, %v1466_v22  ;;  %v2265_v19 = vld [vmem:[%s3042_s20 + $0x10] sm:$0xff]  ;;  %v2424_v20 = vld [vmem:[%s827_s0] ss:$0 sm:$0xff]  ;;  %s3359_s0 = sld [smem:[#allocation32_spill]] }
 0x614   : > { %v1280_v33 = vrot.slane %v1278_v24, 1  ;;  %v1378_v34 = vrot.slane %v1376_v25, 1  ;;  %v1381_v35 = vrot.slane %v1379_v26, 2  ;;  %2133 = vmatmul.msk.bf16.vlgmr.msra.gmra.mxu2 %vm886_vm1, %v1325_v32  ;;  %v1569_v46 = vpack.c.b16 %v1568_v31, %v1568_v31  ;;  %v2264_v26 = vld [vmem:[%s3042_s20 + $0x8] sm:$0xff] }
 0x615   : > { %v1374_v37 = vor.u32 %v1373_v29, %v1370_v28  ;;  %v1425_v47 = vrot.slane %v1423_v38, 2  ;;  %v1426_v48 = vrot.slane %v1365_v16, 2  ;;  %v1470_v50 = vshrl.u32 %v1423_v38, 16 }
 0x616   : > { %v1281_v39 = vsel %vm1269_vm2, %v1276_v27, %v1280_v33  ;;  %v1382_v41 = vor.u32 %v1381_v35, %v1378_v34  ;;  %v1473_v52 = vshll.u32 %v1423_v38, 16  ;;  %v1478_v53 = vshrl.u32 %v1467_v42, 16  ;;  %v2263_v27 = vld [vmem:[%s3042_s20] sm:$0xff] }
 0x617   : > { %2120 = vmatmul.msk.bf16.vlgmr.msrb.gmra.mxu3 %vm886_vm1, %v1281_v39  ;;  %v1481_v54 = vshll.u32 %v1467_v42, 16  ;;  %v1572_v8 = vshrl.u32 %v1525_v45, 16  ;;  %v1575_v55 = vshll.u32 %v1525_v45, 16  ;;  %v1580_v56 = vshrl.u32 %v1569_v46, 16 }
 0x618   : > { %v1383_v44 = vsel %vm1366_vm3, %v1374_v37, %v1382_v41  ;;  %v1583_v57 = vshll.u32 %v1569_v46, 16  ;;  %v1427_v58 = vsel %vm1424_vm4, %v1425_v47, %v1426_v48  ;;  %v1472_v59 = vrot.slane %v1470_v50, 2  ;;  %1703 = vmatpush.bf16.msrb.mxu3 %v2266_v18 }
 0x619   : > { %2146 = vmatmul.msk.bf16.vlgmr.msra.gmra.mxu0 %vm886_vm1, %v1383_v44  ;;  %v1475_v60 = vrot.slane %v1473_v52, 3  ;;  %v1480_v61 = vrot.slane %v1478_v53, 2  ;;  %v1483_v62 = vrot.slane %v1481_v54, 3  ;;  %v1527_v63 = vrot.slane %v1525_v45, 3  ;;  %s3360_s20 = scalar_lea.vmem [#allocation9], %s3359_s0  ;;  %s3362_s8 = scalar_lea.vmem [#allocation10], %s3359_s0 }
 0x61a   : > { %v1528_v0 = vrot.slane %v1467_v42, 3  ;;  %v1574_v2 = vrot.slane %v1572_v8, 3  ;;  %v1577_v3 = vrot.slane %v1575_v55, 4  ;;  %v1582_v4 = vrot.slane %v1580_v56, 3 }
 0x61b   : > { %v1585_v5 = vrot.slane %v1583_v57, 4  ;;  %v1476_v6 = vor.u32 %v1475_v60, %v1472_v59  ;;  %v1484_v7 = vor.u32 %v1483_v62, %v1480_v61  ;;  %v1624_v15 = vpack.c.b16 %v1568_v31, %v3152_v1  ;;  %v2425_v62 = vld [vmem:[%s3360_s20] ss:$0 sm:$0xff] }
 0x61c   : > { %2159 = vmatmul.msk.bf16.vlgmr.msra.gmra.mxu1 %vm886_vm1, %v1427_v58  ;;  %v1529_v10 = vsel %vm1526_vm5, %v1527_v63, %v1528_v0  ;;  %v1578_v11 = vor.u32 %v1577_v3, %v1574_v2  ;;  %1704 = vmatpush.bf16.msrb.mxu3 %v2265_v19 }
 0x61d   : > { %v1586_v12 = vor.u32 %v1585_v5, %v1582_v4  ;;  %v1485_v13 = vsel %vm1468_vm6, %v1476_v6, %v1484_v7 }
 0x61f   : > { %v1587_v14 = vsel %vm1570_vm7, %v1578_v11, %v1586_v12 }
 0x620   : > { %1705 = vmatpush.bf16.msrb.mxu3 %v2264_v26 }
 0x624   : > { %2185 = vmatmul.msk.bf16.vlgmr.msrb.gmra.mxu2 %vm886_vm1, %v1529_v10  ;;  %1706 = vmatpush.bf16.msrb.mxu3 %v2263_v27 }
 0x627   : > { %2172 = vmatmul.msk.bf16.vlgmr.msra.gmra.mxu3 %vm886_vm1, %v1485_v13 }
 0x629   : > { %2198 = vmatmul.msk.bf16.vlgmr.msrb.gmra.mxu0 %vm886_vm1, %v1587_v14 }
 0x62c   : > { %2211 = vmatmul.msk.bf16.vlgmr.msrb.gmra.mxu1 %vm886_vm1, %v1624_v15 }
 0x689   : > { %v1246_v16 = vpop.f32.mrf.mxu1 }
 0x68a   : > { %v1251_v24 = vadd.f32 %v2424_v20, %v1246_v16 }
 0x691   : > { %v1248_v17 = vpop.f32.mrf.mxu1 }
 0x692   : > { %v1252_v32 = vadd.f32 %v2424_v20, %v1248_v17 }
 0x696   : > { %v1408_v21 = vpop.f32.mrf.mxu0 }
 0x697   : > { %v1350_v22 = vpop.f32.mrf.mxu2 }
 0x699   : > { %v1452_v25 = vpop.f32.mrf.mxu1 }
 0x69a   : > { %v1306_v23 = vpop.f32.mrf.mxu3 }
 0x69b   : > { %v1311_v1 = vadd.f32 %v1306_v23, %v1251_v24 }
 0x69d   : > { %v1355_v29 = vadd.f32 %v1350_v22, %v1311_v1 }
 0x69e   : > { %v1410_v30 = vpop.f32.mrf.mxu0 }
 0x69f   : > { %v1352_v28 = vpop.f32.mrf.mxu2  ;;  %v1413_v34 = vadd.f32 %v1408_v21, %v1355_v29 }
 0x6a1   : > { %v1454_v33 = vpop.f32.mrf.mxu1  ;;  %v1457_v37 = vadd.f32 %v1452_v25, %v1413_v34 }
 0x6a2   : > { %v1308_v31 = vpop.f32.mrf.mxu3 }
 0x6a3   : > { %v1312_v35 = vadd.f32 %v1308_v31, %v1252_v32  ;;  %v2426_v31 = vld [vmem:[%s835_s19] ss:$0 sm:$0xff] }
 0x6a5   : > { %v1356_v38 = vadd.f32 %v1352_v28, %v1312_v35 }
 0x6a6   : > { %v1612_v43 = vpop.f32.mrf.mxu0 }
 0x6a7   : > { %v1554_v39 = vpop.f32.mrf.mxu2  ;;  %v1414_v44 = vadd.f32 %v1410_v30, %v1356_v38 }
 0x6a9   : > { %v1649_v45 = vpop.f32.mrf.mxu1  ;;  %v1458_v47 = vadd.f32 %v1454_v33, %v1414_v44  ;;  %v2427_v33 = vld [vmem:[%s3362_s8] ss:$0 sm:$0xff] }
 0x6aa   : > { %v1510_v41 = vpop.f32.mrf.mxu3 }
 0x6ab   : > { %v1515_v42 = vadd.f32 %v1510_v41, %v1457_v37 }
 0x6ad   : > { %v1559_v46 = vadd.f32 %v1554_v39, %v1515_v42 }
 0x6ae   : > { %v1614_v8 = vpop.f32.mrf.mxu0 }
 0x6af   : > { %v1617_v50 = vadd.f32 %v1612_v43, %v1559_v46  ;;  %v1556_v53 = vpop.f32.mrf.mxu2 }
 0x6b1   : > { %v1654_v55 = vadd.f32 %v1649_v45, %v1617_v50  ;;  %v1651_v57 = vpop.f32.mrf.mxu1 }
 0x6b2   : > { %v1512_v48 = vpop.f32.mrf.mxu3 }
 0x6b3   : > { %v1516_v52 = vadd.f32 %v1512_v48, %v1458_v47  ;;  %v1656_v59 = vmax.f32 %v1654_v55, 0.0 }
 0x6b5   : > { %v1560_v54 = vadd.f32 %v1556_v53, %v1516_v52 }
 0x6b7   : > { %v1618_v56 = vadd.f32 %v1614_v8, %v1560_v54 }
 0x6b9   : > { %v1655_v58 = vadd.f32 %v1651_v57, %v1618_v56 }
 0x6bb   : > { %v1657_v60 = vmax.f32 %v1655_v58, 0.0 }
 0x6bd   : > { %v1659_v61 = vpack.c.bf16 %v1657_v60, %v1656_v59 }
 0x6bf   : > { %2228 = vmatmul.msk.bf16.vlgmr.msrb.gmra.mxu3 %vm1695_vm8, %v1659_v61 }
 0x742   : > { %v1708_v63 = vpop.f32.mrf.mxu3 }
 0x743   : > { %v1709_v0 = vadd.f32 %v2425_v62, %v1708_v63 }
 0x745   : > { %v1713_v2 = vadd.f32 %v1709_v0, %v3130_v40 }
 0x747   : > { %v1717_v3 = vsel %vm886_vm1, %v1713_v2, 0.0 }
 0x748   : > { %1718 = vadd.xlane.f32.xlu1 %v1717_v3 }
 0x74a   : > { %v1710_v4 = vpop.f32.mrf.mxu3 }
 0x74b   : > { %v1711_v5 = vadd.f32 %v2425_v62, %v1710_v4 }
 0x74d   : > { %v1714_v6 = vadd.f32 %v1711_v5, %v3142_v51 }
 0x74f   : > { %v1720_v7 = vsel %vm886_vm1, %v1714_v6, 0.0 }
 0x750   : > { %1721 = vadd.xlane.f32.xlu1 %v1720_v7 }
 0x7bb   : > { %v1719_v10 = vpop.xlane.xlu1 %1718 }
 0x7bc   : > { %v1723_v11 = vmul.f32 %v1719_v10, %v3094_v9 }
 0x7be   : > { %v1725_v12 = vsub.f32 %v1713_v2, %v1723_v11 }
 0x7c0   : > { %v1727_v13 = vmul.f32 %v1725_v12, %v1725_v12 }
 0x7c2   : > { %v1729_v14 = vsel %vm886_vm1, %v1727_v13, 0.0 }
 0x7c3   : > { %1730 = vadd.xlane.f32.xlu2 %v1729_v14  ;;  %v1722_v15 = vpop.xlane.xlu1 %1721 }
 0x7c4   : > { %v1724_v40 = vmul.f32 %v1722_v15, %v3094_v9 }
 0x7c6   : > { %v1726_v16 = vsub.f32 %v1714_v6, %v1724_v40 }
 0x7c8   : > { %v1728_v17 = vmul.f32 %v1726_v16, %v1726_v16 }
 0x7ca   : > { %v1732_v18 = vsel %vm886_vm1, %v1728_v17, 0.0 }
 0x7cb   : > { %1733 = vadd.xlane.f32.xlu1 %v1732_v18 }
 0x836   : > { %v1731_v51 = vpop.xlane.xlu2 %1730 }
 0x837   : > { %v1735_v19 = vmul.f32 %v1731_v51, %v3094_v9 }
 0x839   : > { %v1737_v20 = vadd.f32 1e-05, %v1735_v19 }
 0x83b   : > { %2450 = vrsqrt.f32 %v1737_v20  ;;  %vm1745_vm10 = vweird.f32 %v1737_v20 }
 0x83e   : > { %v1734_v21 = vpop.xlane.xlu1 %1733 }
 0x83f   : > { %v1736_v22 = vmul.f32 %v1734_v21, %v3094_v9 }
 0x841   : > { %v2451_v23 = vpop.eup %2450  ;;  %v1738_v24 = vadd.f32 1e-05, %v1736_v22 }
 0x842   : > { %v1740_v25 = vmul.f32 %v2451_v23, %v1737_v20  ;;  %vm1746_vm9 = vweird.f32 %v2451_v23 }
 0x843   : > { %2452 = vrsqrt.f32 %v1738_v24  ;;  %vm1747_vm11 = vmor %vm1745_vm10, %vm1746_vm9  ;;  %vm1755_vm13 = vweird.f32 %v1738_v24 }
 0x844   : > { %v1741_v1 = vmul.f32 %v2451_v23, %v1740_v25 }
 0x846   : > { %v1742_v26 = vmul.f32 0.5, %v1741_v1 }
 0x848   : > { %v1743_v27 = vsub.f32 1.5, %v1742_v26 }
 0x849   : > { %v2453_v28 = vpop.eup %2452 }
 0x84a   : > { %v1744_v29 = vmul.f32 %v2451_v23, %v1743_v27  ;;  %v1750_v30 = vmul.f32 %v2453_v28, %v1738_v24  ;;  %vm1756_vm12 = vweird.f32 %v2453_v28 }
 0x84b   : > { %vm1757_vm14 = vmor %vm1755_vm13, %vm1756_vm12 }
 0x84c   : > { %v1748_v9 = vsel %vm1747_vm11, %v2451_v23, %v1744_v29  ;;  %v1751_v32 = vmul.f32 %v2453_v28, %v1750_v30 }
 0x84d   : > { %v1759_v34 = vmul.f32 %v1748_v9, %v1725_v12 }
 0x84e   : > { %v1752_v35 = vmul.f32 0.5, %v1751_v32 }
 0x84f   : > { %v1764_v37 = vmul.f32 %v2426_v31, %v1759_v34 }
 0x850   : > { %v1753_v38 = vsub.f32 1.5, %v1752_v35 }
 0x851   : > { %v1769_v39 = vadd.f32 %v2427_v33, %v1764_v37 }
 0x852   : > { %v1754_v41 = vmul.f32 %v2453_v28, %v1753_v38 }
 0x853   : > { %v1771_v42 = vmul.f32 %v1769_v39, %v3126_v36 }
 0x854   : > { %v1758_v43 = vsel %vm1757_vm14, %v2453_v28, %v1754_v41 }
 0x855   : > { %1773 = vst.msk [vmem:[#allocation2] sm:$0xff] %vm886_vm1, %v1771_v42  ;;  %v1760_v44 = vmul.f32 %v1758_v43, %v1726_v16 }
 0x857   : > { %v1765_v45 = vmul.f32 %v2426_v31, %v1760_v44 }
 0x859   : > { %v1770_v46 = vadd.f32 %v2427_v33, %v1765_v45  ;;  %1778 = sbr.rel (%p2229_p12) target bundleno = 2150 (0x866), region = 108 }
 0x85b   : > { %v1772_v47 = vmul.f32 %v1770_v46, %v3138_v49 }
 0x85d   : > { %1774 = vst.msk [vmem:[#allocation2 + $0x8] sm:$0xff] %vm886_vm1, %v1772_v47 }
 0x85e   : > { %v1779_v48 = vld [vmem:[#allocation2] sm:$0xff] }
 0x85f   : > { %1781 = vst.msk [vmem:[%s3044_s14] sm:$0xff] %vm886_vm1, %v1779_v48 }
 0x864   : > { %v1780_v50 = vld [vmem:[#allocation2 + $0x8] sm:$0xff] }
 0x865   : > { %1782 = vst.msk [vmem:[%s3044_s14 + $0x8] sm:$0xff] %vm886_vm1, %v1780_v50 }
 0x866 PF: > { %s3363_s12 = sld [smem:[#allocation22_spill]]  ;;  %s1796_s27 = sshll.u32 %s3044_s14, 4  ;;  %s1797_s27 = int_to_ptr.vmem [resolvable:$true] %s1796_s27 }
 0x867   : > { %s3364_s19 = sld [smem:[#allocation18_spill]] }
 0x868   : > { %s3366_s17 = sld [smem:[#allocation49_spill]] }
 0x86c   : > { %s2267_s1 = sshll.u32 %s3363_s12, 4 }
 0x86d   : > { %s3367_s15 = sand.u32 1, %s3364_s19  }
 0x86e   : > { %s1795_s25 = scalar_lea.hbm %s3366_s17, %s2267_s1  ;;  %s1784_s30 = scalar_lea.sflag [#allocation6], %s3367_s15 }
 0x86f   : > { %s1798_s13 = sshll.u32 %s1795_s25, 4  ;;  %s2594_s24 = scalar_lea.hbm %s3366_s17, 32  ;;  %s1799_s13 = int_to_ptr.hbm [resolvable:$true] %s1798_s13 }
 0x870   : > { %s2588_s10 = sshra.s32 %s1799_s13, 4  ;;  %s2589_s10 = int_to_ptr.hbm [resolvable:$true] %s2588_s10 }
 0x871   : > { %s2590_s9 = scalar_lea.hbm %s2589_s10, 16  ;;  %p2595_p2 = scmp.lt.s32.totalorder %s2589_s10, %s3366_s17 }
 0x872   : > { %p2591_p13 = scmp.ne.s32.totalorder %s2589_s10, %s2590_s9  ;;  %p2596_p4 = scmp.lt.s32.totalorder %s2594_s24, %s2590_s9 }
 0x874   : > { %p2592_p0 = pnand %p2591_p13, %p2921_p3  ;;  %p2597_p6 = por %p2596_p4, %p2595_p2 }
 0x876   : > { %p2593_p1 = pneg %p2592_p0 }
 0x878   : > { %p2598_p8 = pnand %p2597_p6, %p2593_p1 }
 0x87a   : > { %2601 = shalt.err (!%p2598_p8)
}
 0x87b   : > { %s2719_s14 = smov 128   ;;  %s2720_s22 = smov 8  }
 0x87c   : > { %2285 = dma.vmem_to_hbm [thread:$0]  (%p2921_p3), %s1797_s27, 256, %s1799_s13, %s1784_s30, %s2719_s14, %s2719_s14, %s2720_s22  }
 0x87d PF: > { %s3368_s18 = sld [smem:[#allocation25_spill]] }
 0x87e   : > { %s3369_s21 = sld [smem:[#allocation17_spill]] }
 0x883   : > { %p2308_p10 = scmp.ge.s32.totalorder %s3368_s18, 2 }
 0x884   : > { %s1813_s20 = sand.u32 1, %s3369_s21  }
 0x885   : > { %p2302_p7 = pnand %p2308_p10, %p2926_p5  ;;  %s1814_s29 = scalar_lea.sflag [#allocation6], %s1813_s20 }
 0x887   : > { %p2303_p9 = pneg %p2302_p7 }
 0x889   : > { %2659 = dma.done.wait (%p2303_p9), %s1814_s29, 256  }
 0x88a   : > { %2661 = vsyncadd (%p2303_p9), %s1814_s29, 4294967040  ;;  %s36_s0 = sadd.s32 1, %s3368_s18   ;;  %s3371_s21 = sld [smem:[#allocation18_spill]] }
 0x88b   : > { %p33_p11 = scmp.ge.s32.totalorder %s36_s0, 6   ;;  %s3372_s22 = sld [smem:[#allocation19_spill]] }
 0x88c   : > { %s3373_s23 = sld [smem:[#allocation29_spill]] }
 0x88d   : > { %s3374_s24 = sld [smem:[#allocation20_spill]] }
 0x88e   : > { %s3375_s25 = sld [smem:[#allocation21_spill]] }
 0x88f   : > { %s3376_s26 = sld [smem:[#allocation28_spill]]  ;;  %35 = sbr.rel (!%p33_p11) target bundleno = 28 (0x1c), region = 210 }
 0x890   : > { %s3377_s27 = sld [smem:[#allocation23_spill]] }
 0x891   : > { %s3378_s28 = sld [smem:[#allocation24_spill]] }
 0x892   : > { %s3379_s29 = sld [smem:[#allocation26_spill]] }
 0x893   : > { %s3380_s30 = sld [smem:[#allocation27_spill]] }
 0x894   :  { %1820 = vsyncpa [#allocation5], 1 }
 0x895   :  { %1822 = vsyncpa [#allocation5 + $0x1], 1 }
 0x896   :  { %1823 = vsyncpa [#allocation8], 1 }
 0x897   :  { %1825 = vsyncpa [#allocation8 + $0x1], 1 }
 0x898   :  { %1826 = vsyncpa [#allocation11], 1 }
 0x899   :  { %1828 = vsyncpa [#allocation11 + $0x1], 1 }
 0x89a   :  { %1829 = vsyncpa [#allocation6], 1 }
 0x89b   :  { %1831 = vsyncpa [#allocation6 + $0x1], 1 }

</bundles_post_ra>
